<compile_context>
chip_gen: v6e
topology: v6e:2x2x1
jax: 0.10.0
libtpu: 0.0.40
codegen_flags: <defaults>
</compile_context>

<pallas_src>
import functools

import numpy as np
import jax
import jax.numpy as jnp
from jax import lax
from jax.experimental import pallas as pl
from jax.experimental.pallas import tpu as pltpu


# Probe once whether this jax version supports pipeline_mode=pl.Buffered(...).
try:
    pl.BlockSpec((8, 128), lambda i: (0, 0), pipeline_mode=pl.Buffered(1))
    _HAS_BUFFERED = True
except Exception:  # pragma: no cover - older jax
    _HAS_BUFFERED = False


# ----------------------------------------------------------------------------
# Kernel helpers
# ----------------------------------------------------------------------------

def _ln_relu(h, g_ref, b_ref, eps):
    """torch.nn.LayerNorm over channels (biased var, eps=1e-8) + ReLU, f32.

    Centered two-pass statistics (mean, then E[(x-mu)^2]); rsqrt on the EUP.
    """
    inv_c = 1.0 / h.shape[-1]
    mu = jnp.sum(h, axis=-1, keepdims=True) * inv_c
    d = h - mu
    var = jnp.sum(d * d, axis=-1, keepdims=True) * inv_c
    y = d * lax.rsqrt(var + eps)
    y = y * g_ref[...].astype(jnp.float32) + b_ref[...].astype(jnp.float32)
    return jnp.maximum(y, 0.0)


def _store_out(o_ref, res_f32):
    """Store (Bt, L, C) result; reshape to the lane-dense (Bt, L*C) block if used."""
    if len(o_ref.shape) == 2:
        res_f32 = res_f32.reshape(o_ref.shape)
    o_ref[...] = res_f32.astype(o_ref.dtype)


# ----------------------------------------------------------------------------
# Kernels
# ----------------------------------------------------------------------------

def _conv_kernel(x_ref, w1_ref, b1_ref, g1_ref, bt1_ref,
                 w2_ref, b2_ref, g2_ref, bt2_ref,
                 o_ref, xp_ref, *, kernel_size, dilation, eps, pad,
                 fuse_taps, mm_precision):
    """Causal dilated conv1 -> LN -> ReLU -> causal conv2 (2*dil) -> LN -> ReLU -> +x."""
    Bt, Lp, C = xp_ref.shape
    L = Lp - pad
    k = kernel_size

    # Zero the shared causal left-pad region of the scratch.  Done every step
    # (not only at program_id==0) so it stays correct under megacore
    # "parallel" sharding where each core has its own scratch instance.
    if pad > 0:
        xp_ref[:, :pad, :] = jnp.zeros((Bt, pad, C), xp_ref.dtype)

    def causal_conv(w_ref, b_ref, dil):
        # out[b, t] = sum_j x[b, t - (k-1-j)*dil] @ W[j] + bias   (zeros for t<0)
        bias = b_ref[...].astype(jnp.float32)
        if fuse_taps:
            # Small C: stack taps along channels so the conv is ONE matmul (K = k*C).
            taps = [xp_ref[:, pad - (k - 1 - j) * dil: pad - (k - 1 - j) * dil + L, :]
                    for j in range(k)]
            stacked = jnp.concatenate(taps, axis=-1).reshape(Bt * L, k * C)
            return jnp.dot(stacked, w_ref[...], preferred_element_type=jnp.float32,
                           precision=mm_precision) + bias
        # Large C: k accumulated matmuls, no tap concatenate (K = C saturates MXU).
        acc = None
        for j in range(k):
            start = pad - (k - 1 - j) * dil
            tap = xp_ref[:, start:start + L, :].reshape(Bt * L, C)
            d = jnp.dot(tap, w_ref[j], preferred_element_type=jnp.float32,
                        precision=mm_precision)
            acc = d if acc is None else acc + d
        return acc + bias

    xp_ref[:, pad:, :] = x_ref[...].astype(xp_ref.dtype)
    out1 = _ln_relu(causal_conv(w1_ref, b1_ref, dilation), g1_ref, bt1_ref, eps)
    xp_ref[:, pad:, :] = out1.reshape(Bt, L, C).astype(xp_ref.dtype)
    out2 = _ln_relu(causal_conv(w2_ref, b2_ref, 2 * dilation), g2_ref, bt2_ref, eps)
    # Residual: re-read the VMEM-resident input block (x not held live above).
    res = out2.reshape(Bt, L, C) + x_ref[...].astype(jnp.float32)
    _store_out(o_ref, res)


def _mp_kernel(x_ref, mw1_ref, mb1_ref, mw2_ref, mb2_ref,
               g1_ref, bt1_ref, g2_ref, bt2_ref,
               o_ref, *, eps, compute_dtype, mm_precision):
    """is_mp=True branch: mp(x) -> LN -> ReLU -> mp(.) -> LN -> ReLU -> +x
    (the same mp weights are used for both applications, as in the torch module)."""
    Bt, L, C = x_ref.shape

    def mp_block(inp):
        h = (jnp.dot(inp.astype(compute_dtype), mw1_ref[...],
                     preferred_element_type=jnp.float32, precision=mm_precision)
             + mb1_ref[...].astype(jnp.float32))
        h = jnp.where(h >= 0, h, 0.01 * h)              # F.leaky_relu (slope 0.01)
        return (jnp.dot(h.astype(compute_dtype), mw2_ref[...],
                        preferred_element_type=jnp.float32, precision=mm_precision)
                + mb2_ref[...].astype(jnp.float32))

    out1 = _ln_relu(mp_block(x_ref[...].reshape(Bt * L, C)), g1_ref, bt1_ref, eps)
    out2 = _ln_relu(mp_block(out1), g2_ref, bt2_ref, eps)
    res = out2.reshape(Bt, L, C) + x_ref[...].astype(jnp.float32)
    _store_out(o_ref, res)


# ----------------------------------------------------------------------------
# Wrapper
# ----------------------------------------------------------------------------

def _tpu_caps():
    """(usable VMEM bytes, tensor cores per device) with safe fallbacks."""
    vmem_cap = 64 * 1024 * 1024           # conservative default (valid on v7x)
    n_cores = 1
    try:
        info = pltpu.get_tpu_info()
        cap = getattr(info, "vmem_capacity_bytes", None)
        if cap:
            vmem_cap = int(cap)
    except Exception:
        pass
    try:
        dev = jax.devices()[0]
        kind = str(getattr(dev, "device_kind", "")).lower()
        nc = getattr(dev, "num_cores", None)
        if nc:
            n_cores = max(n_cores, int(nc))
        if "v7" in kind or "tpu7" in kind:
            n_cores = max(n_cores, 2)
            vmem_cap = min(vmem_cap, 64 * 1024 * 1024)
    except Exception:
        pass
    return vmem_cap, n_cores


def _pick_batch_tile(B, L, requested, per_row_bytes, fixed_bytes, vmem_budget, n_cores):
    if requested is not None:
        if B % requested != 0:
            raise ValueError(f"batch_tile {requested} must divide batch {B}")
        return requested
    fitting = []
    for bt in range(1, B + 1):
        if B % bt != 0:
            continue
        # Only multi-TensorCore parts (v7x) need >= 2 grid steps for core balance.
        if n_cores >= 2 and B >= 2 and (B // bt) < 2:
            continue
        if fixed_bytes + bt * per_row_bytes <= vmem_budget:
            fitting.append(bt)
    if not fitting:
        return 1
    # Smallest tile that fills the MXU M dim (Bt*L >= 512); else largest that fits.
    for bt in fitting:
        if bt * L >= 512:
            return bt
    return fitting[-1]


def _const_spec(shape):
    nd = len(shape)
    idx = lambda *_: (0,) * nd
    if _HAS_BUFFERED:
        # Grid-invariant block: single-buffer it (constant index_map -> no re-DMA).
        return pl.BlockSpec(shape, idx, pipeline_mode=pl.Buffered(1))
    return pl.BlockSpec(shape, idx)


def residual_block_b_2mp_serial(x, params, *, kernel_size, dilation, is_mp=False,
                                batch_tile=None, compute_dtype=jnp.bfloat16):
    B, L, C = x.shape
    k = kernel_size
    cdt = jnp.dtype(compute_dtype)
    # f32 operands: force true-f32 matmul accuracy; bf16 operands are native MXU.
    mm_precision = lax.Precision.HIGHEST if cdt == jnp.float32 else None
    vmem_cap, n_cores = _tpu_caps()

    itemsize_x = x.dtype.itemsize

    if is_mp:
        hid = C // 4
        hid_p = -(-hid // 128) * 128               # lane-pad hidden dim to >= 128
        pad = 0
        kern = functools.partial(_mp_kernel, eps=1e-8, compute_dtype=cdt,
                                 mm_precision=mm_precision)
        mw1, mb1, mw2 = params["mw1"], params["mb1"], params["mw2"]
        if hid_p != hid:
            mw1 = jnp.pad(mw1, ((0, 0), (0, hid_p - hid)))
            mb1 = jnp.pad(mb1, ((0, 0), (0, hid_p - hid)))
            mw2 = jnp.pad(mw2, ((0, hid_p - hid), (0, 0)))
        param_args = (mw1.astype(cdt), mb1, mw2.astype(cdt), params["mb2"],
                      params["g1"], params["bt1"], params["g2"], params["bt2"])
        param_specs = [_const_spec((C, hid_p)), _const_spec((1, hid_p)),
                       _const_spec((hid_p, C)), _const_spec((1, C)),
                       _const_spec((1, C)), _const_spec((1, C)),
                       _const_spec((1, C)), _const_spec((1, C))]
        per_row = (4 * L * C * itemsize_x          # double-buffered in + out blocks
                   + L * hid_p * 4                 # hidden activations (f32 acc)
                   + 3 * L * C * 4)                # f32 intermediates / residual
        scratch_fn = lambda Bt: ()
    else:
        # Shared causal left pad for both convs (conv2 has the larger reach),
        # rounded up to a sublane multiple for aligned scratch writes.
        pad = -(-((k - 1) * dilation * 2) // 8) * 8
        fuse_taps = C < 256
        kern = functools.partial(_conv_kernel, kernel_size=k, dilation=dilation,
                                 eps=1e-8, pad=pad, fuse_taps=fuse_taps,
                                 mm_precision=mm_precision)
        if fuse_taps:
            # Stack the k taps along the contraction dim: (k, Cin, Cout) -> (k*Cin, Cout).
            w1 = params["w1"].reshape(k * C, C).astype(cdt)
            w2 = params["w2"].reshape(k * C, C).astype(cdt)
            w_shape = (k * C, C)
        else:
            w1 = params["w1"].astype(cdt)
            w2 = params["w2"].astype(cdt)
            w_shape = (k, C, C)
        param_args = (w1, params["b1"], params["g1"], params["bt1"],
                      w2, params["b2"], params["g2"], params["bt2"])
        param_specs = [_const_spec(w_shape), _const_spec((1, C)),
                       _const_spec((1, C)), _const_spec((1, C)),
                       _const_spec(w_shape), _const_spec((1, C)),
                       _const_spec((1, C)), _const_spec((1, C))]
        per_row = (4 * L * C * itemsize_x                                 # in/out blocks
                   + (pad + L) * C * cdt.itemsize                         # causal scratch
                   + (k if fuse_taps else 1) * L * C * cdt.itemsize       # matmul operand
                   + 3 * L * C * 4)                                       # f32 intermediates
        scratch_fn = lambda Bt: (pltpu.VMEM((Bt, pad + L, C), cdt),)

    param_bytes = sum(int(np.prod(a.shape)) * a.dtype.itemsize for a in param_args)
    param_factor = 1 if _HAS_BUFFERED else 2
    fixed_bytes = param_factor * param_bytes

    Bt = _pick_batch_tile(B, L, batch_tile, per_row, fixed_bytes,
                          vmem_budget=vmem_cap // 2, n_cores=n_cores)
    grid = (B // Bt,)

    # Lane-dense output when C is not a lane multiple and the block shape allows it
    # (avoids masked vst.msk partial stores on the output path).
    lane_dense = (C % 128 != 0) and ((L * C) % 128 == 0) and (Bt == B or Bt % 8 == 0)

    x_spec = pl.BlockSpec((Bt, L, C), lambda b: (b, 0, 0))
    if lane_dense:
        out_shape = jax.ShapeDtypeStruct((B, L * C), x.dtype)
        out_spec = pl.BlockSpec((Bt, L * C), lambda b: (b, 0))
    else:
        out_shape = jax.ShapeDtypeStruct((B, L, C), x.dtype)
        out_spec = x_spec

    need = fixed_bytes + Bt * per_row
    vmem_limit = int(min(max(int(1.25 * need), 32 * 1024 * 1024), vmem_cap))

    out = pl.pallas_call(
        kern,
        out_shape=out_shape,
        grid=grid,
        in_specs=[x_spec] + param_specs,
        out_specs=out_spec,
        scratch_shapes=scratch_fn(Bt),
        compiler_params=pltpu.CompilerParams(
            dimension_semantics=("parallel",),
            vmem_limit_bytes=vmem_limit),
    )(x, *param_args)

    return out.reshape(B, L, C) if lane_dense else out


# ----------------------------------------------------------------------------
# Parameters + pure-JAX reference
# ----------------------------------------------------------------------------

def init_params(key, C, kernel_size):
    hid = C // 4
    ks = jax.random.split(key, 10)
    s = 0.1
    return {
        # conv weights stored as (k, Cin, Cout)  (== torch (Cout, Cin, 1, k) transposed)
        "w1": s * jax.random.normal(ks[0], (kernel_size, C, C), jnp.float32),
        "b1": s * jax.random.normal(ks[1], (1, C), jnp.float32),
        "g1": 1.0 + s * jax.random.normal(ks[2], (1, C), jnp.float32),
        "bt1": s * jax.random.normal(ks[3], (1, C), jnp.float32),
        "w2": s * jax.random.normal(ks[4], (kernel_size, C, C), jnp.float32),
        "b2": s * jax.random.normal(ks[5], (1, C), jnp.float32),
        "g2": 1.0 + s * jax.random.normal(ks[6], (1, C), jnp.float32),
        "bt2": s * jax.random.normal(ks[7], (1, C), jnp.float32),
        # mp: Conv1d(C, C/4, 1) then Conv1d(C/4, C, 1), stored as (in, out) matrices
        "mw1": s * jax.random.normal(ks[8], (C, hid), jnp.float32),
        "mb1": jnp.zeros((1, hid), jnp.float32),
        "mw2": s * jax.random.normal(ks[9], (hid, C), jnp.float32),
        "mb2": jnp.zeros((1, C), jnp.float32),
    }


def ref_forward(x, params, *, kernel_size, dilation, is_mp=False, eps=1e-8):
    """Pure-JAX reference (pad-based causal dilated conv), mirrors the torch forward."""
    prec = lax.Precision.HIGHEST

    def causal_conv(inp, w, b, dil):
        k = w.shape[0]
        p = (k - 1) * dil
        xp = jnp.pad(inp, ((0, 0), (p, 0), (0, 0)))
        out = b[0][None, None, :]
        for j in range(k):
            out = out + jnp.einsum('blc,cd->bld',
                                   xp[:, j * dil: j * dil + inp.shape[1], :], w[j],
                                   precision=prec)
        return out

    def ln_relu(h, g, b):
        mu = jnp.mean(h, axis=-1, keepdims=True)
        var = jnp.mean((h - mu) ** 2, axis=-1, keepdims=True)
        y = (h - mu) / jnp.sqrt(var + eps) * g[0] + b[0]
        return jnp.maximum(y, 0.0)

    def mp_block(inp):
        h = jnp.dot(inp, params["mw1"], precision=prec) + params["mb1"][0]
        h = jnp.where(h >= 0, h, 0.01 * h)
        return jnp.dot(h, params["mw2"], precision=prec) + params["mb2"][0]

    out1 = mp_block(x) if is_mp else causal_conv(x, params["w1"], params["b1"], dilation)
    out1 = ln_relu(out1, params["g1"], params["bt1"])
    out2 = mp_block(out1) if is_mp else causal_conv(out1, params["w2"], params["b2"], dilation * 2)
    out2 = ln_relu(out2, params["g2"], params["bt2"])
    return out2 + x


# ----------------------------------------------------------------------------
# Self-test
# ----------------------------------------------------------------------------

if __name__ == "__main__":
    kernel_size, dilation = 3, 2
    key = jax.random.PRNGKey(0)
    kx, kx2, kp = jax.random.split(key, 3)

    # Small shapes; in_channel == out_channel (required by the residual add).
    B, L, C = 2, 16, 32
    x = jax.random.normal(kx, (B, L, C), jnp.float32)
    params = init_params(kp, C, kernel_size)

    # Conv path (is_mp=False), strict f32 compute.
    out = residual_block_b_2mp_serial(x, params, kernel_size=kernel_size,
                                      dilation=dilation, is_mp=False,
                                      compute_dtype=jnp.float32)
    out = jax.block_until_ready(out)
    ref = ref_forward(x, params, kernel_size=kernel_size, dilation=dilation, is_mp=False)
    np.testing.assert_allclose(np.asarray(out), np.asarray(ref), rtol=1e-4, atol=1e-4)

    # mp path (is_mp=True), strict f32 compute (hidden dim lane-padded internally).
    out_mp = residual_block_b_2mp_serial(x, params, kernel_size=kernel_size,
                                         dilation=dilation, is_mp=True,
                                         compute_dtype=jnp.float32)
    out_mp = jax.block_until_ready(out_mp)
    ref_mp = ref_forward(x, params, kernel_size=kernel_size, dilation=dilation, is_mp=True)
    np.testing.assert_allclose(np.asarray(out_mp), np.asarray(ref_mp), rtol=1e-4, atol=1e-4)

    # Larger batch exercising Bt > 1 (batch folded into the matmul M dim).
    B2 = 8
    xb = jax.random.normal(kx2, (B2, L, C), jnp.float32)
    out_b = residual_block_b_2mp_serial(xb, params, kernel_size=kernel_size,
                                        dilation=dilation, is_mp=False,
                                        compute_dtype=jnp.float32)
    out_b = jax.block_until_ready(out_b)
    ref_b = ref_forward(xb, params, kernel_size=kernel_size, dilation=dilation, is_mp=False)
    np.testing.assert_allclose(np.asarray(out_b), np.asarray(ref_b), rtol=1e-4, atol=1e-4)

    # Default compute dtype (bf16 matmul operands; LN / residual stay f32) -> loose tolerance.
    # Note: x is written into the shared scratch in bf16 before conv1 (intentional).
    out_bf = residual_block_b_2mp_serial(xb, params, kernel_size=kernel_size,
                                         dilation=dilation, is_mp=False)
    out_bf = jax.block_until_ready(out_bf)
    np.testing.assert_allclose(np.asarray(out_bf), np.asarray(ref_b), rtol=5e-2, atol=1e-1)

    print("KERNEL_OK")
</pallas_src>

<mosaic_0001>
module attributes {stable_mosaic.version = 11 : i64} {
  func.func @_conv_kernel(%arg0: i32, %arg1: memref<2x16x32xf32, #tpu.memory_space<vmem>>, %arg2: memref<96x32xf32, #tpu.memory_space<vmem>>, %arg3: memref<1x32xf32, #tpu.memory_space<vmem>>, %arg4: memref<1x32xf32, #tpu.memory_space<vmem>>, %arg5: memref<1x32xf32, #tpu.memory_space<vmem>>, %arg6: memref<96x32xf32, #tpu.memory_space<vmem>>, %arg7: memref<1x32xf32, #tpu.memory_space<vmem>>, %arg8: memref<1x32xf32, #tpu.memory_space<vmem>>, %arg9: memref<1x32xf32, #tpu.memory_space<vmem>>, %arg10: memref<2x512xf32, #tpu.memory_space<vmem>>, %arg11: memref<2x24x32xf32, #tpu.memory_space<vmem>>) attributes {dimension_semantics = [#tpu.dimension_semantics<parallel>], iteration_bounds = array<i64: 1>, scalar_prefetch = 0 : i64, scratch_operands = 1 : i64, tpu.core_type = #tpu.core_type<tc>, window_params = [{transform_indices = @transform_0, window_bounds = array<i64: 2, 16, 32>}, {pipeline_mode = #tpu.pipeline_mode<synchronous>, transform_indices = @transform_1, window_bounds = array<i64: 96, 32>}, {pipeline_mode = #tpu.pipeline_mode<synchronous>, transform_indices = @transform_2, window_bounds = array<i64: 1, 32>}, {pipeline_mode = #tpu.pipeline_mode<synchronous>, transform_indices = @transform_3, window_bounds = array<i64: 1, 32>}, {pipeline_mode = #tpu.pipeline_mode<synchronous>, transform_indices = @transform_4, window_bounds = array<i64: 1, 32>}, {pipeline_mode = #tpu.pipeline_mode<synchronous>, transform_indices = @transform_5, window_bounds = array<i64: 96, 32>}, {pipeline_mode = #tpu.pipeline_mode<synchronous>, transform_indices = @transform_6, window_bounds = array<i64: 1, 32>}, {pipeline_mode = #tpu.pipeline_mode<synchronous>, transform_indices = @transform_7, window_bounds = array<i64: 1, 32>}, {pipeline_mode = #tpu.pipeline_mode<synchronous>, transform_indices = @transform_8, window_bounds = array<i64: 1, 32>}, {transform_indices = @transform_9, window_bounds = array<i64: 2, 512>}]} {
    %cst = arith.constant 0.000000e+00 : f32
    %0 = vector.broadcast %cst : f32 to vector<2x8x32xf32>
    %c0 = arith.constant 0 : index
    %c0_0 = arith.constant 0 : index
    %c0_1 = arith.constant 0 : index
    %1 = vector.load %arg11[%c0, %c0_0, %c0_1] : memref<2x24x32xf32, #tpu.memory_space<vmem>>, vector<2x8x32xf32>
    tpu.vector_store %arg11[%c0, %c0_0, %c0_1], %0 {strides = array<i32>} : memref<2x24x32xf32, #tpu.memory_space<vmem>>, vector<2x8x32xf32>,
    %c0_2 = arith.constant 0 : index
    %c0_3 = arith.constant 0 : index
    %c0_4 = arith.constant 0 : index
    %2 = vector.load %arg1[%c0_2, %c0_3, %c0_4] : memref<2x16x32xf32, #tpu.memory_space<vmem>>, vector<2x16x32xf32>
    %c0_5 = arith.constant 0 : index
    %c8 = arith.constant 8 : index
    %c0_6 = arith.constant 0 : index
    %3 = vector.load %arg11[%c0_5, %c8, %c0_6] : memref<2x24x32xf32, #tpu.memory_space<vmem>>, vector<2x16x32xf32>
    tpu.vector_store %arg11[%c0_5, %c8, %c0_6], %2 {strides = array<i32>} : memref<2x24x32xf32, #tpu.memory_space<vmem>>, vector<2x16x32xf32>,
    %c0_7 = arith.constant 0 : index
    %c0_8 = arith.constant 0 : index
    %4 = vector.load %arg3[%c0_7, %c0_8] : memref<1x32xf32, #tpu.memory_space<vmem>>, vector<1x32xf32>
    %c0_9 = arith.constant 0 : index
    %c4 = arith.constant 4 : index
    %c0_10 = arith.constant 0 : index
    %5 = vector.load %arg11[%c0_9, %c4, %c0_10] : memref<2x24x32xf32, #tpu.memory_space<vmem>>, vector<2x16x32xf32>
    %c0_11 = arith.constant 0 : index
    %c6 = arith.constant 6 : index
    %c0_12 = arith.constant 0 : index
    %6 = vector.load %arg11[%c0_11, %c6, %c0_12] : memref<2x24x32xf32, #tpu.memory_space<vmem>>, vector<2x16x32xf32>
    %c0_13 = arith.constant 0 : index
    %c8_14 = arith.constant 8 : index
    %c0_15 = arith.constant 0 : index
    %7 = vector.load %arg11[%c0_13, %c8_14, %c0_15] : memref<2x24x32xf32, #tpu.memory_space<vmem>>, vector<2x16x32xf32>
    %8 = tpu.concatenate %5, %6, %7 in 2 : vector<2x16x32xf32>, vector<2x16x32xf32>, vector<2x16x32xf32> -> vector<2x16x96xf32>
    %9 = vector.shape_cast %8 : vector<2x16x96xf32> to vector<32x96xf32>
    %c0_16 = arith.constant 0 : index
    %c0_17 = arith.constant 0 : index
    %10 = vector.load %arg2[%c0_16, %c0_17] : memref<96x32xf32, #tpu.memory_space<vmem>>, vector<96x32xf32>
    %cst_18 = arith.constant dense<0.000000e+00> : vector<32x32xf32>
    %11 = tpu.matmul %9, %10, %cst_18 {dimension_numbers = #tpu.dot_dimension_numbers<[1], [0], [0], [1], [0, 0, 1, 1], [], []>, precision = #tpu.contract_precision<fp32>} : vector<32x96xf32>, vector<96x32xf32>, vector<32x32xf32> -> vector<32x32xf32>
    %12 = vector.broadcast %4 : vector<1x32xf32> to vector<32x32xf32>
    %13 = arith.addf %11, %12 : vector<32x32xf32>
    %cst_19 = arith.constant dense<0.000000e+00> : vector<32xf32>
    %14 = vector.multi_reduction <add>, %13, %cst_19 [1] : vector<32x32xf32> to vector<32xf32>
    %15 = vector.shape_cast %14 : vector<32xf32> to vector<32x1xf32>
    %cst_20 = arith.constant 3.125000e-02 : f32
    %16 = vector.broadcast %cst_20 : f32 to vector<32x1xf32>
    %17 = arith.mulf %15, %16 : vector<32x1xf32>
    %18 = vector.broadcast %17 : vector<32x1xf32> to vector<32x32xf32>
    %19 = arith.subf %13, %18 : vector<32x32xf32>
    %20 = arith.mulf %19, %19 : vector<32x32xf32>
    %cst_21 = arith.constant dense<0.000000e+00> : vector<32xf32>
    %21 = vector.multi_reduction <add>, %20, %cst_21 [1] : vector<32x32xf32> to vector<32xf32>
    %22 = vector.shape_cast %21 : vector<32xf32> to vector<32x1xf32>
    %cst_22 = arith.constant 3.125000e-02 : f32
    %23 = vector.broadcast %cst_22 : f32 to vector<32x1xf32>
    %24 = arith.mulf %22, %23 : vector<32x1xf32>
    %cst_23 = arith.constant 9.99999993E-9 : f32
    %25 = vector.broadcast %cst_23 : f32 to vector<32x1xf32>
    %26 = arith.addf %24, %25 : vector<32x1xf32>
    %27 = math.rsqrt %26 : vector<32x1xf32>
    %28 = vector.broadcast %27 : vector<32x1xf32> to vector<32x32xf32>
    %29 = arith.mulf %19, %28 : vector<32x32xf32>
    %c0_24 = arith.constant 0 : index
    %c0_25 = arith.constant 0 : index
    %30 = vector.load %arg4[%c0_24, %c0_25] : memref<1x32xf32, #tpu.memory_space<vmem>>, vector<1x32xf32>
    %31 = vector.broadcast %30 : vector<1x32xf32> to vector<32x32xf32>
    %32 = arith.mulf %29, %31 : vector<32x32xf32>
    %c0_26 = arith.constant 0 : index
    %c0_27 = arith.constant 0 : index
    %33 = vector.load %arg5[%c0_26, %c0_27] : memref<1x32xf32, #tpu.memory_space<vmem>>, vector<1x32xf32>
    %34 = vector.broadcast %33 : vector<1x32xf32> to vector<32x32xf32>
    %35 = arith.addf %32, %34 : vector<32x32xf32>
    %cst_28 = arith.constant 0.000000e+00 : f32
    %36 = vector.broadcast %cst_28 : f32 to vector<32x32xf32>
    %37 = arith.maximumf %35, %36 : vector<32x32xf32>
    %38 = vector.shape_cast %37 : vector<32x32xf32> to vector<2x16x32xf32>
    %c0_29 = arith.constant 0 : index
    %c8_30 = arith.constant 8 : index
    %c0_31 = arith.constant 0 : index
    %39 = vector.load %arg11[%c0_29, %c8_30, %c0_31] : memref<2x24x32xf32, #tpu.memory_space<vmem>>, vector<2x16x32xf32>
    tpu.vector_store %arg11[%c0_29, %c8_30, %c0_31], %38 {strides = array<i32>} : memref<2x24x32xf32, #tpu.memory_space<vmem>>, vector<2x16x32xf32>,
    %c0_32 = arith.constant 0 : index
    %c0_33 = arith.constant 0 : index
    %40 = vector.load %arg7[%c0_32, %c0_33] : memref<1x32xf32, #tpu.memory_space<vmem>>, vector<1x32xf32>
    %c0_34 = arith.constant 0 : index
    %c0_35 = arith.constant 0 : index
    %c0_36 = arith.constant 0 : index
    %41 = vector.load %arg11[%c0_34, %c0_35, %c0_36] : memref<2x24x32xf32, #tpu.memory_space<vmem>>, vector<2x16x32xf32>
    %c0_37 = arith.constant 0 : index
    %c4_38 = arith.constant 4 : index
    %c0_39 = arith.constant 0 : index
    %42 = vector.load %arg11[%c0_37, %c4_38, %c0_39] : memref<2x24x32xf32, #tpu.memory_space<vmem>>, vector<2x16x32xf32>
    %c0_40 = arith.constant 0 : index
    %c8_41 = arith.constant 8 : index
    %c0_42 = arith.constant 0 : index
    %43 = vector.load %arg11[%c0_40, %c8_41, %c0_42] : memref<2x24x32xf32, #tpu.memory_space<vmem>>, vector<2x16x32xf32>
    %44 = tpu.concatenate %41, %42, %43 in 2 : vector<2x16x32xf32>, vector<2x16x32xf32>, vector<2x16x32xf32> -> vector<2x16x96xf32>
    %45 = vector.shape_cast %44 : vector<2x16x96xf32> to vector<32x96xf32>
    %c0_43 = arith.constant 0 : index
    %c0_44 = arith.constant 0 : index
    %46 = vector.load %arg6[%c0_43, %c0_44] : memref<96x32xf32, #tpu.memory_space<vmem>>, vector<96x32xf32>
    %cst_45 = arith.constant dense<0.000000e+00> : vector<32x32xf32>
    %47 = tpu.matmul %45, %46, %cst_45 {dimension_numbers = #tpu.dot_dimension_numbers<[1], [0], [0], [1], [0, 0, 1, 1], [], []>, precision = #tpu.contract_precision<fp32>} : vector<32x96xf32>, vector<96x32xf32>, vector<32x32xf32> -> vector<32x32xf32>
    %48 = vector.broadcast %40 : vector<1x32xf32> to vector<32x32xf32>
    %49 = arith.addf %47, %48 : vector<32x32xf32>
    %cst_46 = arith.constant dense<0.000000e+00> : vector<32xf32>
    %50 = vector.multi_reduction <add>, %49, %cst_46 [1] : vector<32x32xf32> to vector<32xf32>
    %51 = vector.shape_cast %50 : vector<32xf32> to vector<32x1xf32>
    %cst_47 = arith.constant 3.125000e-02 : f32
    %52 = vector.broadcast %cst_47 : f32 to vector<32x1xf32>
    %53 = arith.mulf %51, %52 : vector<32x1xf32>
    %54 = vector.broadcast %53 : vector<32x1xf32> to vector<32x32xf32>
    %55 = arith.subf %49, %54 : vector<32x32xf32>
    %56 = arith.mulf %55, %55 : vector<32x32xf32>
    %cst_48 = arith.constant dense<0.000000e+00> : vector<32xf32>
    %57 = vector.multi_reduction <add>, %56, %cst_48 [1] : vector<32x32xf32> to vector<32xf32>
    %58 = vector.shape_cast %57 : vector<32xf32> to vector<32x1xf32>
    %cst_49 = arith.constant 3.125000e-02 : f32
    %59 = vector.broadcast %cst_49 : f32 to vector<32x1xf32>
    %60 = arith.mulf %58, %59 : vector<32x1xf32>
    %cst_50 = arith.constant 9.99999993E-9 : f32
    %61 = vector.broadcast %cst_50 : f32 to vector<32x1xf32>
    %62 = arith.addf %60, %61 : vector<32x1xf32>
    %63 = math.rsqrt %62 : vector<32x1xf32>
    %64 = vector.broadcast %63 : vector<32x1xf32> to vector<32x32xf32>
    %65 = arith.mulf %55, %64 : vector<32x32xf32>
    %c0_51 = arith.constant 0 : index
    %c0_52 = arith.constant 0 : index
    %66 = vector.load %arg8[%c0_51, %c0_52] : memref<1x32xf32, #tpu.memory_space<vmem>>, vector<1x32xf32>
    %67 = vector.broadcast %66 : vector<1x32xf32> to vector<32x32xf32>
    %68 = arith.mulf %65, %67 : vector<32x32xf32>
    %c0_53 = arith.constant 0 : index
    %c0_54 = arith.constant 0 : index
    %69 = vector.load %arg9[%c0_53, %c0_54] : memref<1x32xf32, #tpu.memory_space<vmem>>, vector<1x32xf32>
    %70 = vector.broadcast %69 : vector<1x32xf32> to vector<32x32xf32>
    %71 = arith.addf %68, %70 : vector<32x32xf32>
    %cst_55 = arith.constant 0.000000e+00 : f32
    %72 = vector.broadcast %cst_55 : f32 to vector<32x32xf32>
    %73 = arith.maximumf %71, %72 : vector<32x32xf32>
    %74 = vector.shape_cast %73 : vector<32x32xf32> to vector<2x16x32xf32>
    %c0_56 = arith.constant 0 : index
    %c0_57 = arith.constant 0 : index
    %c0_58 = arith.constant 0 : index
    %75 = vector.load %arg1[%c0_56, %c0_57, %c0_58] : memref<2x16x32xf32, #tpu.memory_space<vmem>>, vector<2x16x32xf32>
    %76 = arith.addf %74, %75 : vector<2x16x32xf32>
    %77 = vector.shape_cast %76 : vector<2x16x32xf32> to vector<2x512xf32>
    %c0_59 = arith.constant 0 : index
    %c0_60 = arith.constant 0 : index
    %78 = vector.load %arg10[%c0_59, %c0_60] : memref<2x512xf32, #tpu.memory_space<vmem>>, vector<2x512xf32>
    tpu.vector_store %arg10[%c0_59, %c0_60], %77 {strides = array<i32>} : memref<2x512xf32, #tpu.memory_space<vmem>>, vector<2x512xf32>,
    return
  }
  func.func @transform_0(%arg0: i32) -> (i32, i32, i32) {
    %c0_i32 = arith.constant 0 : i32
    %c0_i32_0 = arith.constant 0 : i32
    %c0_i32_1 = arith.constant 0 : i32
    return %arg0, %c0_i32, %c0_i32_0 : i32, i32, i32
  }
  func.func @transform_1(%arg0: i32) -> (i32, i32) {
    %c0_i32 = arith.constant 0 : i32
    %c0_i32_0 = arith.constant 0 : i32
    %c0_i32_1 = arith.constant 0 : i32
    return %c0_i32, %c0_i32_0 : i32, i32
  }
  func.func @transform_2(%arg0: i32) -> (i32, i32) {
    %c0_i32 = arith.constant 0 : i32
    %c0_i32_0 = arith.constant 0 : i32
    %c0_i32_1 = arith.constant 0 : i32
    return %c0_i32, %c0_i32_0 : i32, i32
  }
  func.func @transform_3(%arg0: i32) -> (i32, i32) {
    %c0_i32 = arith.constant 0 : i32
    %c0_i32_0 = arith.constant 0 : i32
    %c0_i32_1 = arith.constant 0 : i32
    return %c0_i32, %c0_i32_0 : i32, i32
  }
  func.func @transform_4(%arg0: i32) -> (i32, i32) {
    %c0_i32 = arith.constant 0 : i32
    %c0_i32_0 = arith.constant 0 : i32
    %c0_i32_1 = arith.constant 0 : i32
    return %c0_i32, %c0_i32_0 : i32, i32
  }
  func.func @transform_5(%arg0: i32) -> (i32, i32) {
    %c0_i32 = arith.constant 0 : i32
    %c0_i32_0 = arith.constant 0 : i32
    %c0_i32_1 = arith.constant 0 : i32
    return %c0_i32, %c0_i32_0 : i32, i32
  }
  func.func @transform_6(%arg0: i32) -> (i32, i32) {
    %c0_i32 = arith.constant 0 : i32
    %c0_i32_0 = arith.constant 0 : i32
    %c0_i32_1 = arith.constant 0 : i32
    return %c0_i32, %c0_i32_0 : i32, i32
  }
  func.func @transform_7(%arg0: i32) -> (i32, i32) {
    %c0_i32 = arith.constant 0 : i32
    %c0_i32_0 = arith.constant 0 : i32
    %c0_i32_1 = arith.constant 0 : i32
    return %c0_i32, %c0_i32_0 : i32, i32
  }
  func.func @transform_8(%arg0: i32) -> (i32, i32) {
    %c0_i32 = arith.constant 0 : i32
    %c0_i32_0 = arith.constant 0 : i32
    %c0_i32_1 = arith.constant 0 : i32
    return %c0_i32, %c0_i32_0 : i32, i32
  }
  func.func @transform_9(%arg0: i32) -> (i32, i32) {
    %c0_i32 = arith.constant 0 : i32
    %c0_i32_0 = arith.constant 0 : i32
    return %arg0, %c0_i32 : i32, i32
  }
}

</mosaic_0001>

<bundles_post_ra>
// kernel: tpu_custom_call.1
= control target key start
LH: loop header
LB: loop body
LE: loop exit
PB: predicated region body
PF: predicated region fallthrough
CT: control target
= control target key end

     0   :  { %vm33_vm0 = vcmask 261120   ;;  %v2646_v2 = vmov 0.0   ;;  %s3520_s0 = inlined_call_operand.vmem [shape: f32[2,16,32], index: 0, kind: input, shape index: {}]   ;;  %s3521_s1 = inlined_call_operand.vmem [shape: f32[96,32], index: 1, kind: input, shape index: {}]   ;;  %s3522_s2 = inlined_call_operand.vmem [shape: f32[1,32], index: 2, kind: input, shape index: {}]   ;;  %s3523_s3 = inlined_call_operand.vmem [shape: f32[1,32], index: 3, kind: input, shape index: {}]   ;;  %s3524_s4 = inlined_call_operand.vmem [shape: f32[1,32], index: 4, kind: input, shape index: {}]   ;;  %s3525_s5 = inlined_call_operand.vmem [shape: f32[96,32], index: 5, kind: input, shape index: {}]   ;;  %s3526_s6 = inlined_call_operand.vmem [shape: f32[1,32], index: 6, kind: input, shape index: {}]   ;;  %s3527_s7 = inlined_call_operand.vmem [shape: f32[1,32], index: 7, kind: input, shape index: {}]   ;;  %s3528_s8 = inlined_call_operand.vmem [shape: f32[1,32], index: 8, kind: input, shape index: {}]   ;;  %s3529_s9 = inlined_call_operand.hbm [shape: f32[2,512], index: 9, kind: output, shape index: {}]  }
   0x1   :  { %v36_v0 = vld [vmem:[%s3520_s0] sm:$0xff]  ;;  %v37_v1 = vld [vmem:[%s3520_s0 + $0x8] sm:$0xff]  ;;  %34 = vst.msk [vmem:[#allocation2] sm:$0xff] %vm33_vm0, %v2646_v2  ;;  %35 = vst.msk [vmem:[#allocation2 + $0x18] sm:$0xff] %vm33_vm0, %v2646_v2 }
   0x2   :  { %40 = vst.msk [vmem:[#allocation2 + $0x8] sm:$0xff] %vm33_vm0, %v36_v0  ;;  %41 = vst.msk [vmem:[#allocation2 + $0x10] sm:$0xff] %vm33_vm0, %v37_v1  ;;  %v38_v3 = vld [vmem:[%s3520_s0 + $0x10] sm:$0xff]  ;;  %v39_v4 = vld [vmem:[%s3520_s0 + $0x18] sm:$0xff] }
   0x3   :  { %v109_v5 = vld [vmem:[%s3521_s1 + $0x58] sm:$0xff]  ;;  %42 = vst.msk [vmem:[#allocation2 + $0x20] sm:$0xff] %vm33_vm0, %v38_v3  ;;  %43 = vst.msk [vmem:[#allocation2 + $0x28] sm:$0xff] %vm33_vm0, %v39_v4  ;;  %v108_v7 = vld [vmem:[%s3521_s1 + $0x50] sm:$0xff] }
   0x4   :  { %v2726_v6 = vand.u32 4294901760, %v109_v5  ;;  %v107_v8 = vld [vmem:[%s3521_s1 + $0x48] sm:$0xff]  ;;  %v106_v9 = vld [vmem:[%s3521_s1 + $0x40] sm:$0xff]  ;;  %v2737_v10 = vand.u32 4294901760, %v108_v7  ;;  %v105_v13 = vld [vmem:[%s3521_s1 + $0x38] sm:$0xff] }
   0x5   :  { %v2739_v11 = vand.u32 4294901760, %v107_v8  ;;  %v2741_v12 = vand.u32 4294901760, %v106_v9  ;;  %v104_v14 = vld [vmem:[%s3521_s1 + $0x30] sm:$0xff]  ;;  %v2753_v16 = vand.u32 4294901760, %v105_v13  ;;  %v103_v17 = vld [vmem:[%s3521_s1 + $0x28] sm:$0xff] }
   0x6   :  { %v2750_v15 = vsub.f32 %v109_v5, %v2726_v6  ;;  %2241 = vmatprep.subr.mxu0 %v2726_v6  ;;  %v2759_v18 = vsub.f32 %v108_v7, %v2737_v10  ;;  %v2768_v21 = vand.u32 4294901760, %v104_v14 }
   0x7   :  { %v2762_v19 = vsub.f32 %v107_v8, %v2739_v11  ;;  %v2765_v20 = vsub.f32 %v106_v9, %v2741_v12  ;;  %2242 = vmatpush3.msra.mxu0 %v2726_v6 }
   0x8   :  { %14 = vsyncpa [#allocation4], 0  ;;  %v2771_v22 = vand.u32 4294901760, %v2750_v15  ;;  %2243 = vmatprep.subr.mxu0 %v2737_v10  ;;  %v102_v23 = vld [vmem:[%s3521_s1 + $0x20] sm:$0xff]  ;;  %v2778_v24 = vand.u32 4294901760, %v2759_v18  ;;  %v2784_v26 = vsub.f32 %v105_v13, %v2753_v16  ;;  %v2787_v27 = vand.u32 4294901760, %v103_v17 }
   0x9   :  { %v2781_v25 = vand.u32 4294901760, %v2762_v19  ;;  %2244 = vmatpush3.msra.mxu0 %v2737_v10  ;;  %v49_v28 = vld [vmem:[#allocation2 + $0x6] sm:$0xff]  ;;  %v2792_v31 = vand.u32 4294901760, %v2765_v20  ;;  %s2647_s12 = smov 32   ;;  %s2648_s13 = smov 64   ;;  %v2800_v33 = vsub.f32 %v104_v14, %v2768_v21  ;;  %v2802_v34 = vand.u32 4294901760, %v102_v23 }
   0xa   :  { %v53_v29 = vld [vmem:[#allocation2 + $0x8] sm:$0xff]  ;;  %v258_v30 = vsub.f32 %v2750_v15, %v2771_v22  ;;  %2245 = vmatprep.subr.mxu0 %v2739_v11  ;;  %61 = vrot.lane.b32.xlu0 %v49_v28, %s2647_s12  ;;  %v265_v32 = vsub.f32 %v2759_v18, %v2778_v24  ;;  %v101_v35 = vld [vmem:[%s3521_s1 + $0x18] sm:$0xff]  ;;  %v54_v37 = vld [vmem:[#allocation2 + $0x10] sm:$0xff]  ;;  %v2814_v42 = vand.u32 4294901760, %v2784_v26  ;;  %v2817_v43 = vsub.f32 %v103_v17, %v2787_v27 }
   0xb   :  { %77 = vrot.lane.b32.xlu1 %v53_v29, %s2648_s13  ;;  %v50_v36 = vld [vmem:[#allocation2 + $0xe] sm:$0xff]  ;;  %v272_v39 = vsub.f32 %v2762_v19, %v2781_v25  ;;  %2246 = vmatpush3.msra.mxu0 %v2739_v11  ;;  %v279_v44 = vsub.f32 %v2765_v20, %v2792_v31  ;;  %v2823_v45 = vand.u32 4294901760, %v101_v35  ;;  %v2831_v47 = vand.u32 4294901760, %v2800_v33  ;;  %v51_v50 = vld [vmem:[#allocation2 + $0x1e] sm:$0xff]  ;;  %v52_v51 = vld [vmem:[#allocation2 + $0x26] sm:$0xff] }
   0xc   :  { %v259_v38 = vand.u32 4294901760, %v258_v30  ;;  %v100_v40 = vld [vmem:[%s3521_s1 + $0x10] sm:$0xff]  ;;  %v266_v41 = vand.u32 4294901760, %v265_v32  ;;  %2247 = vmatprep.subr.mxu0 %v2741_v12  ;;  %v99_v46 = vld [vmem:[%s3521_s1 + $0x8] sm:$0xff]  ;;  %v2834_v48 = vsub.f32 %v102_v23, %v2802_v34  ;;  %v98_v53 = vld [vmem:[%s3521_s1] sm:$0xff]  ;;  %v286_v54 = vsub.f32 %v2784_v26, %v2814_v42 }
   0xd   :  { %2248 = vmatpush3.msra.mxu0 %v2741_v12  ;;  %v2836_v49 = vand.u32 4294901760, %v100_v40  ;;  %v273_v52 = vand.u32 4294901760, %v272_v39  ;;  %v2845_v55 = vand.u32 4294901760, %v2817_v43  ;;  %v2848_v56 = vsub.f32 %v101_v35, %v2823_v45  ;;  %v55_v63 = vld [vmem:[#allocation2 + $0x20] sm:$0xff]  ;;  %v56_v0 = vld [vmem:[#allocation2 + $0x28] sm:$0xff] }
   0xe   :  { %2271 = vmatprep.subr.mxu1 %v259_v38  ;;  %63 = vrot.lane.b32.xlu0 %v50_v36, %s2647_s12  ;;  %v2851_v57 = vand.u32 4294901760, %v99_v46  ;;  %v280_v58 = vand.u32 4294901760, %v279_v44  ;;  %v293_v59 = vsub.f32 %v2800_v33, %v2831_v47  ;;  %v2859_v60 = vand.u32 4294901760, %v2834_v48 }
   0xf   :  { %79 = vrot.lane.b32.xlu1 %v54_v37, %s2648_s13  ;;  %2272 = vmatpush3.msra.mxu1 %v259_v38  ;;  %v2862_v61 = vsub.f32 %v100_v40, %v2836_v49  ;;  %v2864_v62 = vand.u32 4294901760, %v98_v53  ;;  %v287_v1 = vand.u32 4294901760, %v286_v54  ;;  %v300_v3 = vsub.f32 %v2817_v43, %v2845_v55  ;;  %v45_v40 = vld [vmem:[#allocation2 + $0x4] sm:$0xff] }
  0x10   :  { %2249 = vmatprep.subr.mxu0 %v2753_v16  ;;  %2273 = vmatprep.subr.mxu1 %v266_v41  ;;  %v2870_v4 = vand.u32 4294901760, %v2848_v56  ;;  %v2874_v5 = vsub.f32 %v99_v46, %v2851_v57  ;;  %v294_v7 = vand.u32 4294901760, %v293_v59  ;;  %v307_v8 = vsub.f32 %v2834_v48, %v2859_v60 }
  0x11   :  { %2250 = vmatpush3.msra.mxu0 %v2753_v16  ;;  %2274 = vmatpush3.msra.mxu1 %v266_v41  ;;  %v2882_v9 = vand.u32 4294901760, %v2862_v61  ;;  %v2885_v13 = vsub.f32 %v98_v53, %v2864_v62  ;;  %v301_v14 = vand.u32 4294901760, %v300_v3  ;;  %vm93_vm1 = vcmask 523264   ;;  %v47_v3 = vld [vmem:[#allocation2 + $0x1c] sm:$0xff] }
  0x12   :  { %2251 = vmatprep.subr.mxu0 %v2768_v21  ;;  %65 = vrot.lane.b32.xlu0 %v51_v50, %s2647_s12  ;;  %v314_v17 = vsub.f32 %v2848_v56, %v2870_v4  ;;  %v2891_v23 = vand.u32 4294901760, %v2874_v5  ;;  %v308_v28 = vand.u32 4294901760, %v307_v8  ;;  %vm116_vm2 = vcmask 785408  }
  0x13   :  { %67 = vrot.lane.b32.xlu1 %v52_v51, %s2647_s12  ;;  %2275 = vmatprep.subr.mxu1 %v273_v52  ;;  %v321_v29 = vsub.f32 %v2862_v61, %v2882_v9  ;;  %v2898_v30 = vand.u32 4294901760, %v2885_v13  ;;  %v46_v51 = vld [vmem:[#allocation2 + $0xc] sm:$0xff] }
  0x14   :  { %2252 = vmatpush3.msra.mxu0 %v2768_v21  ;;  %2276 = vmatpush3.msra.mxu1 %v273_v52  ;;  %v315_v32 = vand.u32 4294901760, %v314_v17  ;;  %v328_v35 = vsub.f32 %v2874_v5, %v2891_v23 }
  0x15   :  { %2253 = vmatprep.subr.mxu0 %v2787_v27  ;;  %2277 = vmatprep.subr.mxu1 %v280_v58  ;;  %v322_v36 = vand.u32 4294901760, %v321_v29  ;;  %v335_v37 = vsub.f32 %v2885_v13, %v2898_v30 }
  0x16   :  { %2254 = vmatpush3.msra.mxu0 %v2787_v27  ;;  %81 = vrot.lane.b32.xlu0 %v55_v63, %s2648_s13  ;;  %v329_v38 = vand.u32 4294901760, %v328_v35 }
  0x17   :  { %83 = vrot.lane.b32.xlu1 %v56_v0, %s2648_s13  ;;  %2278 = vmatpush3.msra.mxu1 %v280_v58  ;;  %v336_v39 = vand.u32 4294901760, %v335_v37 }
  0x18   :  { %2255 = vmatprep.subr.mxu0 %v2802_v34  ;;  %2279 = vmatprep.subr.mxu1 %v287_v1 }
  0x19   :  { %2256 = vmatpush3.msra.mxu0 %v2802_v34  ;;  %2280 = vmatpush3.msra.mxu1 %v287_v1 }
  0x1a   :  { %2257 = vmatprep.subr.mxu0 %v2823_v45  ;;  %2281 = vmatprep.subr.mxu1 %v294_v7 }
  0x1b   :  { %2258 = vmatpush3.msra.mxu0 %v2823_v45  ;;  %2282 = vmatpush3.msra.mxu1 %v294_v7  ;;  %v48_v7 = vld [vmem:[#allocation2 + $0x24] sm:$0xff] }
  0x1c   :  { %2259 = vmatprep.subr.mxu0 %v2836_v49  ;;  %2283 = vmatprep.subr.mxu1 %v301_v14 }
  0x1d   :  { %2260 = vmatpush3.msra.mxu0 %v2836_v49  ;;  %2284 = vmatpush3.msra.mxu1 %v301_v14 }
  0x1e   :  { %2261 = vmatprep.subr.mxu0 %v2851_v57  ;;  %2285 = vmatprep.subr.mxu1 %v308_v28 }
  0x1f   :  { %2262 = vmatpush3.msra.mxu0 %v2851_v57  ;;  %2286 = vmatpush3.msra.mxu1 %v308_v28 }
  0x20   :  { %2263 = vmatprep.subr.mxu0 %v2864_v62  ;;  %2287 = vmatprep.subr.mxu1 %v315_v32 }
  0x21   :  { %2264 = vmatpush3.msra.mxu0 %v2864_v62  ;;  %2288 = vmatpush3.msra.mxu1 %v315_v32 }
  0x22   :  { %2301 = vmatprep.subr.mxu0 %v2750_v15  ;;  %2289 = vmatprep.subr.mxu1 %v322_v36 }
  0x23   :  { %2290 = vmatpush3.msra.mxu1 %v322_v36 }
  0x24   :  { %2291 = vmatprep.subr.mxu1 %v329_v38 }
  0x25   :  { %2292 = vmatpush3.msra.mxu1 %v329_v38 }
  0x26   :  { %2293 = vmatprep.subr.mxu1 %v336_v39 }
  0x27   :  { %2294 = vmatpush3.msra.mxu1 %v336_v39 }
  0x28   :  { %2331 = vmatprep.subr.mxu1 %v2726_v6 }
  0x7c   :  { %v62_v41 = vpop.permute.xlu0 %61 }
  0x7d   :  { %v78_v44 = vpop.permute.xlu1 %77  ;;  %v89_v46 = vsel %vm33_vm0, %v45_v40, %v62_v41 }
  0x7e   :  { %v94_v50 = vsel %vm93_vm1, %v89_v46, %v78_v44 }
  0x7f   :  { %v118_v52 = vsel %vm116_vm2, %v94_v50, 0 }
  0x80   :  { %v2916_v53 = vand.u32 4294901760, %v118_v52  ;;  %v64_v54 = vpop.permute.xlu0 %63 }
  0x81   :  { %v80_v58 = vpop.permute.xlu1 %79  ;;  %v90_v59 = vsel %vm33_vm0, %v46_v51, %v64_v54 }
  0x82   :  { %v2920_v63 = vsub.f32 %v118_v52, %v2916_v53  ;;  %v95_v0 = vsel %vm93_vm1, %v90_v59, %v80_v58  ;;  %2295 = vmatprep.mubr.f32.mxu1 %v2916_v53 }
  0x83   :  { %v121_v1 = vsel %vm116_vm2, %v95_v0, 0 }
  0x84   :  { %v2925_v8 = vand.u32 4294901760, %v121_v1  ;;  %v66_v14 = vpop.permute.xlu0 %65  ;;  %v208_v28 = vand.u32 4294901760, %v2920_v63 }
  0x85   :  { %v68_v17 = vpop.permute.xlu1 %67  ;;  %v91_v32 = vsel %vm33_vm0, %v47_v3, %v66_v14 }
  0x86   :  { %v2929_v29 = vsub.f32 %v121_v1, %v2925_v8  ;;  %v92_v35 = vsel %vm33_vm0, %v48_v7, %v68_v17  ;;  %2296 = vmatmul.mubr.f32.vlgmr.msra.gmra.mxu1 %v2925_v8  ;;  %v209_v36 = vsub.f32 %v2920_v63, %v208_v28 }
  0x87   :  { %2332 = vmatpush3.msra.mxu1 %v2726_v6 }
  0x88   :  { %2333 = vmatprep.subr.mxu1 %v2737_v10  ;;  %v82_v37 = vpop.permute.xlu0 %81  ;;  %v210_v39 = vand.u32 4294901760, %v209_v36  ;;  %v218_v40 = vand.u32 4294901760, %v2929_v29 }
  0x89   :  { %v84_v38 = vpop.permute.xlu1 %83  ;;  %v96_v41 = vsel %vm93_vm1, %v91_v32, %v82_v37  ;;  %2334 = vmatpush3.msra.mxu1 %v2737_v10 }
  0x8a   :  { %v97_v44 = vsel %vm93_vm1, %v92_v35, %v84_v38  ;;  %v124_v46 = vsel %vm116_vm2, %v96_v41, 0  ;;  %2335 = vmatprep.subr.mxu1 %v2739_v11  ;;  %2265 = vmatprep.mubr.f32.mxu0 %v210_v39  ;;  %v219_v51 = vsub.f32 %v2929_v29, %v218_v40 }
  0x8b   :  { %v127_v50 = vsel %vm116_vm2, %v97_v44, 0  ;;  %v2945_v52 = vand.u32 4294901760, %v124_v46  ;;  %2336 = vmatpush3.msra.mxu1 %v2739_v11 }
  0x8c   :  { %v2947_v54 = vand.u32 4294901760, %v127_v50  ;;  %2337 = vmatprep.subr.mxu1 %v2741_v12  ;;  %v220_v58 = vand.u32 4294901760, %v219_v51 }
  0x8d   :  { %v2952_v59 = vsub.f32 %v124_v46, %v2945_v52  ;;  %2338 = vmatpush3.msra.mxu1 %v2741_v12  ;;  %2298 = vmatprep.mubr.f32.mxu1 %v2945_v52 }
  0x8e   :  { %v2955_v0 = vsub.f32 %v127_v50, %v2947_v54  ;;  %2339 = vmatprep.subr.mxu1 %v2753_v16  ;;  %2266 = vmatmul.mubr.f32.vlgmr.msra.gmra.mxu0 %v220_v58 }
  0x8f   :  { %2299 = vmatmul.mubr.f32.gmra.mxu1 %v2947_v54  ;;  %2302 = vmatpush3.msra.mxu0 %v2750_v15  ;;  %v228_v1 = vand.u32 4294901760, %v2952_v59 }
  0x90   :  { %v238_v3 = vand.u32 4294901760, %v2955_v0  ;;  %2340 = vmatpush3.msra.mxu1 %v2753_v16  ;;  %2303 = vmatprep.subr.mxu0 %v2759_v18 }
  0x91   :  { %2341 = vmatprep.subr.mxu1 %v2768_v21  ;;  %2355 = vmatprep.mubr.f32.mxu1 %v208_v28  ;;  %v229_v7 = vsub.f32 %v2952_v59, %v228_v1 }
  0x92   :  { %v239_v14 = vsub.f32 %v2955_v0, %v238_v3  ;;  %2304 = vmatpush3.msra.mxu0 %v2759_v18  ;;  %2342 = vmatpush3.msra.mxu1 %v2768_v21 }
  0x93   :  { %2305 = vmatprep.subr.mxu0 %v2762_v19  ;;  %2343 = vmatprep.subr.mxu1 %v2787_v27  ;;  %v230_v15 = vand.u32 4294901760, %v229_v7 }
  0x94   :  { %2306 = vmatpush3.msra.mxu0 %v2762_v19  ;;  %2344 = vmatpush3.msra.mxu1 %v2787_v27  ;;  %v240_v17 = vand.u32 4294901760, %v239_v14 }
  0x95   :  { %2307 = vmatprep.subr.mxu0 %v2765_v20  ;;  %2345 = vmatprep.subr.mxu1 %v2802_v34 }
  0x96   :  { %2308 = vmatpush3.msra.mxu0 %v2765_v20  ;;  %2346 = vmatpush3.msra.mxu1 %v2802_v34 }
  0x97   :  { %2268 = vmatprep.mubr.f32.mxu0 %v230_v15  ;;  %2309 = vmatprep.subr.mxu0 %v2784_v26 }
  0x98   :  { %2347 = vmatprep.subr.mxu1 %v2823_v45  ;;  %2269 = vmatmul.mubr.f32.gmra.mxu0 %v240_v17 }
  0x99   :  { %2310 = vmatpush3.msra.mxu0 %v2784_v26  ;;  %2348 = vmatpush3.msra.mxu1 %v2823_v45 }
  0x9a   :  { %2311 = vmatprep.subr.mxu0 %v2800_v33  ;;  %2325 = vmatprep.mubr.f32.mxu0 %v2920_v63 }
  0x9b   :  { %2349 = vmatprep.subr.mxu1 %v2836_v49  ;;  %2312 = vmatpush3.msra.mxu0 %v2800_v33 }
  0x9c   :  { %2350 = vmatpush3.msra.mxu1 %v2836_v49  ;;  %2313 = vmatprep.subr.mxu0 %v2817_v43 }
  0x9d   :  { %2351 = vmatprep.subr.mxu1 %v2851_v57  ;;  %2314 = vmatpush3.msra.mxu0 %v2817_v43 }
  0x9e   :  { %2352 = vmatpush3.msra.mxu1 %v2851_v57  ;;  %2315 = vmatprep.subr.mxu0 %v2834_v48 }
  0x9f   :  { %2353 = vmatprep.subr.mxu1 %v2864_v62  ;;  %2316 = vmatpush3.msra.mxu0 %v2834_v48 }
  0xa0   :  { %2354 = vmatpush3.msra.mxu1 %v2864_v62  ;;  %2317 = vmatprep.subr.mxu0 %v2848_v56 }
  0xa1   :  { %2356 = vmatmul.mubr.f32.vlgmr.msra.gmra.mxu1 %v218_v40  ;;  %2391 = vmatprep.subr.mxu1 %v2726_v6 }
  0xa2   :  { %2318 = vmatpush3.msra.mxu0 %v2848_v56  ;;  %2358 = vmatprep.mubr.f32.mxu1 %v228_v1 }
  0xa3   :  { %2392 = vmatpush3.msra.mxu1 %v2726_v6  ;;  %2319 = vmatprep.subr.mxu0 %v2862_v61 }
  0xa4   :  { %2393 = vmatprep.subr.mxu1 %v2737_v10  ;;  %2320 = vmatpush3.msra.mxu0 %v2862_v61 }
  0xa5   :  { %2394 = vmatpush3.msra.mxu1 %v2737_v10  ;;  %2321 = vmatprep.subr.mxu0 %v2874_v5 }
  0xa6   :  { %2359 = vmatmul.mubr.f32.gmra.mxu1 %v238_v3  ;;  %2395 = vmatprep.subr.mxu1 %v2739_v11 }
  0xa7   :  { %2322 = vmatpush3.msra.mxu0 %v2874_v5  ;;  %2396 = vmatpush3.msra.mxu1 %v2739_v11 }
  0xa8   :  { %2415 = vmatprep.mubr.f32.mxu1 %v2916_v53  ;;  %2323 = vmatprep.subr.mxu0 %v2885_v13 }
  0xa9   :  { %2397 = vmatprep.subr.mxu1 %v2741_v12  ;;  %2324 = vmatpush3.msra.mxu0 %v2885_v13 }
  0xaa   :  { %2398 = vmatpush3.msra.mxu1 %v2741_v12  ;;  %2326 = vmatmul.mubr.f32.vlgmr.msra.gmra.mxu0 %v2929_v29 }
  0xab   :  { %2361 = vmatprep.subr.mxu0 %v2771_v22  ;;  %2399 = vmatprep.subr.mxu1 %v2753_v16 }
  0xac   :  { %2328 = vmatprep.mubr.f32.mxu0 %v2952_v59  ;;  %2362 = vmatpush3.msra.mxu0 %v2771_v22  ;;  %v2043_v22 = vld [vmem:[%s3522_s2] ss:$0 sm:$0xff] }
  0xad   :  { %2400 = vmatpush3.msra.mxu1 %v2753_v16  ;;  %2363 = vmatprep.subr.mxu0 %v2778_v24 }
  0xae   :  { %2401 = vmatprep.subr.mxu1 %v2768_v21  ;;  %2364 = vmatpush3.msra.mxu0 %v2778_v24 }
  0xaf   :  { %2402 = vmatpush3.msra.mxu1 %v2768_v21  ;;  %2329 = vmatmul.mubr.f32.gmra.mxu0 %v2955_v0 }
  0xb0   :  { %2365 = vmatprep.subr.mxu0 %v2781_v25  ;;  %2403 = vmatprep.subr.mxu1 %v2787_v27 }
  0xb1   :  { %2366 = vmatpush3.msra.mxu0 %v2781_v25  ;;  %2385 = vmatprep.mubr.f32.mxu0 %v2916_v53 }
  0xb2   :  { %2404 = vmatpush3.msra.mxu1 %v2787_v27  ;;  %2367 = vmatprep.subr.mxu0 %v2792_v31 }
  0xb3   :  { %2405 = vmatprep.subr.mxu1 %v2802_v34  ;;  %2368 = vmatpush3.msra.mxu0 %v2792_v31 }
  0xb4   :  { %2406 = vmatpush3.msra.mxu1 %v2802_v34  ;;  %2369 = vmatprep.subr.mxu0 %v2814_v42 }
  0xb5   :  { %2407 = vmatprep.subr.mxu1 %v2823_v45  ;;  %2370 = vmatpush3.msra.mxu0 %v2814_v42 }
  0xb6   :  { %2408 = vmatpush3.msra.mxu1 %v2823_v45  ;;  %2371 = vmatprep.subr.mxu0 %v2831_v47 }
  0xb7   :  { %2409 = vmatprep.subr.mxu1 %v2836_v49  ;;  %2372 = vmatpush3.msra.mxu0 %v2831_v47 }
  0xb8   :  { %2410 = vmatpush3.msra.mxu1 %v2836_v49  ;;  %2373 = vmatprep.subr.mxu0 %v2845_v55 }
  0xb9   :  { %2411 = vmatprep.subr.mxu1 %v2851_v57  ;;  %2374 = vmatpush3.msra.mxu0 %v2845_v55 }
  0xba   :  { %2412 = vmatpush3.msra.mxu1 %v2851_v57  ;;  %2375 = vmatprep.subr.mxu0 %v2859_v60 }
  0xbb   :  { %2413 = vmatprep.subr.mxu1 %v2864_v62  ;;  %2376 = vmatpush3.msra.mxu0 %v2859_v60 }
  0xbc   :  { %2414 = vmatpush3.msra.mxu1 %v2864_v62  ;;  %2377 = vmatprep.subr.mxu0 %v2870_v4 }
  0xbd   :  { %2416 = vmatmul.mubr.f32.vlgmr.msra.gmra.mxu1 %v2925_v8  ;;  %2378 = vmatpush3.msra.mxu0 %v2870_v4 }
  0xbe   :  { %2418 = vmatprep.mubr.f32.mxu1 %v2945_v52  ;;  %2379 = vmatprep.subr.mxu0 %v2882_v9 }
  0xbf   :  { %2380 = vmatpush3.msra.mxu0 %v2882_v9 }
  0xc0   :  { %2381 = vmatprep.subr.mxu0 %v2891_v23 }
  0xc1   :  { %2419 = vmatmul.mubr.f32.gmra.mxu1 %v2947_v54  ;;  %2382 = vmatpush3.msra.mxu0 %v2891_v23 }
  0xc2   :  { %2383 = vmatprep.subr.mxu0 %v2898_v30 }
  0xc3   :  { %2384 = vmatpush3.msra.mxu0 %v2898_v30 }
  0xc4   :  { %2386 = vmatmul.mubr.f32.vlgmr.msra.gmra.mxu0 %v2925_v8 }
  0xc5   :  { %2388 = vmatprep.mubr.f32.mxu0 %v2945_v52 }
  0xc8   :  { %2389 = vmatmul.mubr.f32.gmra.mxu0 %v2947_v54 }
 0x146   :  { %v2297_v6 = vpop.f32.mrf.mxu1 }
 0x148   :  { %v373_v10 = vpop.f32.mrf.mxu1 }
 0x14e   :  { %v2267_v11 = vpop.f32.mrf.mxu0 }
 0x14f   :  { %v2300_v12 = vpop.f32.mrf.mxu1  ;;  %v223_v26 = vadd.f32 %v2267_v11, %v2043_v22 }
 0x150   :  { %v212_v16 = vpop.f32.mrf.mxu0 }
 0x151   :  { %v385_v19 = vpop.f32.mrf.mxu1  ;;  %v213_v33 = vadd.f32 %v2043_v22, %v212_v16  ;;  %v380_v34 = vadd.f32 %v2297_v6, %v223_v26  ;;  %v989_v26 = vld [vmem:[%s3525_s5 + $0x48] sm:$0xff] }
 0x153   :  { %v374_v49 = vadd.f32 %v373_v10, %v213_v33  ;;  %v3103_v33 = vand.u32 4294901760, %v989_v26 }
 0x158   :  { %v2270_v18 = vpop.f32.mrf.mxu0 }
 0x159   :  { %v243_v45 = vadd.f32 %v2270_v18, %v2043_v22 }
 0x15a   :  { %v232_v21 = vpop.f32.mrf.mxu0 }
 0x15b   :  { %v233_v47 = vadd.f32 %v2043_v22, %v232_v21  ;;  %v392_v60 = vadd.f32 %v2300_v12, %v243_v45 }
 0x15d   :  { %v386_v61 = vadd.f32 %v385_v19, %v233_v47 }
 0x161   :  { %v2357_v20 = vpop.f32.mrf.mxu1 }
 0x163   :  { %v593_v24 = vpop.f32.mrf.mxu1 }
 0x166   :  { %v2360_v27 = vpop.f32.mrf.mxu1 }
 0x168   :  { %v609_v42 = vpop.f32.mrf.mxu1 }
 0x16a   :  { %v2327_v25 = vpop.f32.mrf.mxu0 }
 0x16b   :  { %v495_v48 = vadd.f32 %v2327_v25, %v380_v34  ;;  %v990_v25 = vld [vmem:[%s3525_s5 + $0x50] sm:$0xff]  ;;  %v988_v34 = vld [vmem:[%s3525_s5 + $0x40] sm:$0xff] }
 0x16c   :  { %v487_v31 = vpop.f32.mrf.mxu0  ;;  %v3114_v45 = vand.u32 4294901760, %v988_v34 }
 0x16d   :  { %v488_v56 = vadd.f32 %v487_v31, %v374_v49  ;;  %v602_v62 = vadd.f32 %v2357_v20, %v495_v48  ;;  %v3101_v31 = vand.u32 4294901760, %v990_v25  ;;  %v985_v49 = vld [vmem:[%s3525_s5 + $0x28] sm:$0xff] }
 0x16f   :  { %v2330_v43 = vpop.f32.mrf.mxu0  ;;  %v594_v30 = vadd.f32 %v593_v24, %v488_v56  ;;  %v991_v24 = vld [vmem:[%s3525_s5 + $0x58] sm:$0xff]  ;;  %v3127_v56 = vsub.f32 %v990_v25, %v3101_v31 }
 0x170   :  { %v509_v9 = vadd.f32 %v2330_v43, %v392_v60  ;;  %v986_v43 = vld [vmem:[%s3525_s5 + $0x30] sm:$0xff]  ;;  %v3133_v60 = vand.u32 4294901760, %v985_v49 }
 0x171   :  { %v501_v57 = vpop.f32.mrf.mxu0  ;;  %v3118_v48 = vand.u32 4294901760, %v986_v43 }
 0x172   :  { %v502_v13 = vadd.f32 %v501_v57, %v386_v61  ;;  %v618_v32 = vadd.f32 %v2360_v27, %v509_v9  ;;  %v3099_v27 = vand.u32 4294901760, %v991_v24  ;;  %v3130_v57 = vsub.f32 %v989_v26, %v3103_v33 }
 0x173   :  { %v3136_v61 = vsub.f32 %v988_v34, %v3114_v45  ;;  %v982_v34 = vld [vmem:[%s3525_s5 + $0x10] sm:$0xff] }
 0x174   :  { %v610_v36 = vadd.f32 %v609_v42, %v502_v13  ;;  %v987_v42 = vld [vmem:[%s3525_s5 + $0x38] sm:$0xff]  ;;  %2421 = vmatprep.subr.mxu0 %v3099_v27  ;;  %v3149_v9 = vand.u32 4294901760, %v3130_v57  ;;  %v3153_v13 = vsub.f32 %v986_v43, %v3118_v48  ;;  %v2045_v43 = vld [vmem:[%s3524_s4] ss:$0 sm:$0xff] }
 0x175   :  { %v3116_v47 = vand.u32 4294901760, %v987_v42  ;;  %2422 = vmatpush3.msra.mxu0 %v3099_v27 }
 0x176   :  { %2423 = vmatprep.subr.mxu0 %v3101_v31 }
 0x177   :  { %2424 = vmatpush3.msra.mxu0 %v3101_v31 }
 0x178   :  { %2425 = vmatprep.subr.mxu0 %v3103_v33 }
 0x179   :  { %2426 = vmatpush3.msra.mxu0 %v3103_v33 }
 0x17a   :  { %2427 = vmatprep.subr.mxu0 %v3114_v45 }
 0x17b   :  { %2428 = vmatpush3.msra.mxu0 %v3114_v45 }
 0x17c   :  { %2429 = vmatprep.subr.mxu0 %v3116_v47 }
 0x17d   :  { %v2417_v55 = vpop.f32.mrf.mxu1  ;;  %2430 = vmatpush3.msra.mxu0 %v3116_v47 }
 0x17e   :  { %2431 = vmatprep.subr.mxu0 %v3118_v48 }
 0x17f   :  { %v825_v4 = vpop.f32.mrf.mxu1  ;;  %2432 = vmatpush3.msra.mxu0 %v3118_v48 }
 0x180   :  { %2433 = vmatprep.subr.mxu0 %v3133_v60 }
 0x181   :  { %v2420_v28 = vpop.f32.mrf.mxu1  ;;  %2434 = vmatpush3.msra.mxu0 %v3133_v60 }
 0x183   :  { %v837_v44 = vpop.f32.mrf.mxu1 }
 0x184   :  { %v2387_v5 = vpop.f32.mrf.mxu0 }
 0x185   :  { %v731_v23 = vadd.f32 %v2387_v5, %v602_v62  ;;  %v3139_v62 = vsub.f32 %v987_v42, %v3116_v47  ;;  %v3146_v5 = vand.u32 4294901760, %v3127_v56 }
 0x186   :  { %v724_v53 = vpop.f32.mrf.mxu0 }
 0x187   :  { %v725_v63 = vadd.f32 %v724_v53, %v594_v30  ;;  %v832_v8 = vadd.f32 %v2417_v55, %v731_v23  ;;  %v3124_v55 = vsub.f32 %v991_v24, %v3099_v27  ;;  %v3156_v23 = vand.u32 4294901760, %v3136_v61 }
 0x188   :  { %v2390_v29 = vpop.f32.mrf.mxu0  ;;  %v3160_v30 = vsub.f32 %v985_v49, %v3133_v60 }
 0x189   :  { %v850_v35 = vsel %vm33_vm0, %v832_v8, 0.0  ;;  %v826_v37 = vadd.f32 %v825_v4, %v725_v63  ;;  %v743_v39 = vadd.f32 %v2390_v29, %v618_v32  ;;  %v3143_v4 = vand.u32 4294901760, %v3124_v55 }
 0x18a   :  { %851 = vadd.xlane.f32.xlu1 %v850_v35  ;;  %v736_v38 = vpop.f32.mrf.mxu0  ;;  %v1146_v63 = vsub.f32 %v3127_v56, %v3146_v5  ;;  %v1160_v35 = vsub.f32 %v3136_v61, %v3156_v23 }
 0x18b   :  { %v737_v40 = vadd.f32 %v736_v38, %v610_v36  ;;  %v847_v41 = vsel %vm33_vm0, %v826_v37, 0.0  ;;  %v844_v51 = vadd.f32 %v2420_v28, %v743_v39  ;;  %v1139_v53 = vsub.f32 %v3124_v55, %v3143_v4 }
 0x18c   :  { %848 = vadd.xlane.f32.xlu0 %v847_v41  ;;  %v3169_v28 = vand.u32 4294901760, %v3139_v62  ;;  %v1147_v32 = vand.u32 4294901760, %v1146_v63  ;;  %v3176_v36 = vand.u32 4294901760, %v3153_v13  ;;  %v3183_v39 = vand.u32 4294901760, %v3160_v30 }
 0x18d   :  { %v838_v46 = vadd.f32 %v837_v44, %v737_v40  ;;  %v856_v52 = vsel %vm33_vm0, %v844_v51, 0.0  ;;  %v1140_v29 = vand.u32 4294901760, %v1139_v53  ;;  %v1161_v40 = vand.u32 4294901760, %v1160_v35 }
 0x18e   :  { %v1167_v38 = vsub.f32 %v3139_v62, %v3169_v28  ;;  %v1174_v41 = vsub.f32 %v3153_v13, %v3176_v36  ;;  %v3226_v63 = vand.u32 4294901760, %v982_v34 }
 0x18f   :  { %v853_v50 = vsel %vm33_vm0, %v838_v46, 0.0  ;;  %2451 = vmatprep.subr.mxu1 %v1140_v29 }
 0x190   :  { %854 = vadd.xlane.f32.xlu0 %v853_v50  ;;  %2452 = vmatpush3.msra.mxu1 %v1140_v29  ;;  %v1168_v44 = vand.u32 4294901760, %v1167_v38  ;;  %v1175_v50 = vand.u32 4294901760, %v1174_v41  ;;  %v981_v29 = vld [vmem:[%s3525_s5 + $0x8] sm:$0xff]  ;;  %v980_v41 = vld [vmem:[%s3525_s5] sm:$0xff] }
 0x191   :  { %2453 = vmatprep.subr.mxu1 %v1147_v32  ;;  %v3242_v38 = vand.u32 4294901760, %v981_v29 }
 0x192   :  { %2454 = vmatpush3.msra.mxu1 %v1147_v32 }
 0x194   :  { %857 = vadd.xlane.f32.xlu0 %v856_v52 }
 0x213   :  { %v852_v54 = vpop.xlane.xlu1 %851 }
 0x214   :  { %v860_v58 = vmul.f32 0.03125, %v852_v54 }
 0x215   :  { %v849_v59 = vpop.xlane.xlu0 %848 }
 0x216   :  { %v3070_v0 = vsub.f32 %v832_v8, %v860_v58  ;;  %v859_v1 = vmul.f32 0.03125, %v849_v59  ;;  %v1153_v8 = vsub.f32 %v3130_v57, %v3149_v9 }
 0x218   :  { %v3072_v3 = vsub.f32 %v826_v37, %v859_v1  ;;  %v868_v7 = vmul.f32 %v3070_v0, %v3070_v0  ;;  %v1154_v37 = vand.u32 4294901760, %v1153_v8 }
 0x219   :  { %v855_v14 = vpop.xlane.xlu0 %854 }
 0x21a   :  { %v861_v15 = vmul.f32 0.03125, %v855_v14  ;;  %v874_v17 = vsel %vm33_vm0, %v868_v7, 0.0  ;;  %v867_v6 = vmul.f32 %v3072_v3, %v3072_v3  ;;  %2455 = vmatprep.subr.mxu1 %v1154_v37 }
 0x21b   :  { %875 = vadd.xlane.f32.xlu0 %v874_v17  ;;  %2456 = vmatpush3.msra.mxu1 %v1154_v37  ;;  %v3240_v37 = vsub.f32 %v982_v34, %v3226_v63 }
 0x21c   :  { %v3079_v10 = vsub.f32 %v838_v46, %v861_v15  ;;  %v871_v11 = vsel %vm33_vm0, %v867_v6, 0.0  ;;  %v1181_v46 = vsub.f32 %v3160_v30, %v3183_v39  ;;  %2457 = vmatprep.subr.mxu1 %v1161_v40 }
 0x21d   :  { %872 = vadd.xlane.f32.xlu1 %v871_v11  ;;  %v858_v12 = vpop.xlane.xlu0 %857  ;;  %2458 = vmatpush3.msra.mxu1 %v1161_v40 }
 0x21e   :  { %v862_v16 = vmul.f32 0.03125, %v858_v12  ;;  %v869_v18 = vmul.f32 %v3079_v10, %v3079_v10  ;;  %2459 = vmatprep.subr.mxu1 %v1168_v44 }
 0x21f   :  { %2460 = vmatpush3.msra.mxu1 %v1168_v44 }
 0x220   :  { %v3084_v19 = vsub.f32 %v844_v51, %v862_v16  ;;  %v877_v20 = vsel %vm33_vm0, %v869_v18, 0.0  ;;  %v1182_v51 = vand.u32 4294901760, %v1181_v46  ;;  %2461 = vmatprep.subr.mxu1 %v1175_v50  ;;  %v984_v16 = vld [vmem:[%s3525_s5 + $0x20] sm:$0xff] }
 0x221   :  { %878 = vadd.xlane.f32.xlu1 %v877_v20  ;;  %2462 = vmatpush3.msra.mxu1 %v1175_v50  ;;  %v3198_v18 = vand.u32 4294901760, %v984_v16  ;;  %v983_v20 = vld [vmem:[%s3525_s5 + $0x18] sm:$0xff] }
 0x222   :  { %v870_v21 = vmul.f32 %v3084_v19, %v3084_v19  ;;  %2463 = vmatprep.subr.mxu1 %v1182_v51  ;;  %v3209_v25 = vand.u32 4294901760, %v983_v20 }
 0x223   :  { %2464 = vmatpush3.msra.mxu1 %v1182_v51  ;;  %v3207_v24 = vsub.f32 %v984_v16, %v3198_v18  ;;  %2435 = vmatprep.subr.mxu0 %v3198_v18  ;;  %v3252_v51 = vand.u32 4294901760, %v3240_v37 }
 0x224   :  { %v880_v22 = vsel %vm33_vm0, %v870_v21, 0.0  ;;  %2436 = vmatpush3.msra.mxu0 %v3198_v18  ;;  %v3224_v53 = vsub.f32 %v983_v20, %v3209_v25 }
 0x225   :  { %881 = vadd.xlane.f32.xlu0 %v880_v22  ;;  %v2044_v22 = vld [vmem:[%s3523_s3] ss:$0 sm:$0xff]  ;;  %v3221_v49 = vand.u32 4294901760, %v3207_v24  ;;  %2437 = vmatprep.subr.mxu0 %v3209_v25 }
 0x226   :  { %2438 = vmatpush3.msra.mxu0 %v3209_v25  ;;  %v3237_v35 = vand.u32 4294901760, %v3224_v53 }
 0x227   :  { %v1188_v32 = vsub.f32 %v3207_v24, %v3221_v49  ;;  %2439 = vmatprep.subr.mxu0 %v3226_v63 }
 0x228   :  { %2440 = vmatpush3.msra.mxu0 %v3226_v63  ;;  %v1195_v50 = vsub.f32 %v3224_v53, %v3237_v35 }
 0x229   :  { %v1189_v46 = vand.u32 4294901760, %v1188_v32  ;;  %2441 = vmatprep.subr.mxu0 %v3242_v38 }
 0x22a   :  { %2442 = vmatpush3.msra.mxu0 %v3242_v38 }
 0x22b   :  { %2465 = vmatprep.subr.mxu1 %v1189_v46 }
 0x22c   :  { %2466 = vmatpush3.msra.mxu1 %v1189_v46 }
 0x2a4   :  { %v876_v52 = vpop.xlane.xlu0 %875 }
 0x2a5   :  { %v884_v54 = vmul.f32 0.03125, %v876_v52  ;;  %v3255_v52 = vsub.f32 %v981_v29, %v3242_v38 }
 0x2a6   :  { %v873_v58 = vpop.xlane.xlu1 %872 }
 0x2a7   :  { %v888_v59 = vadd.f32 1e-08, %v884_v54  ;;  %v883_v1 = vmul.f32 0.03125, %v873_v58 }
 0x2a9   :  { %2608 = vrsqrt.f32 %v888_v59  ;;  %v887_v7 = vadd.f32 1e-08, %v883_v1  ;;  %v3259_v1 = vand.u32 4294901760, %v980_v41 }
 0x2aa   :  { %v879_v14 = vpop.xlane.xlu1 %878 }
 0x2ab   :  { %2610 = vrsqrt.f32 %v887_v7  ;;  %v885_v15 = vmul.f32 0.03125, %v879_v14  ;;  %v1196_v7 = vand.u32 4294901760, %v1195_v50  ;;  %v1202_v14 = vsub.f32 %v3240_v37, %v3252_v51  ;;  %2443 = vmatprep.subr.mxu0 %v3259_v1 }
 0x2ac   :  { %2444 = vmatpush3.msra.mxu0 %v3259_v1 }
 0x2ad   :  { %v889_v17 = vadd.f32 1e-08, %v885_v15  ;;  %v3265_v15 = vand.u32 4294901760, %v3255_v52  ;;  %2467 = vmatprep.subr.mxu1 %v1196_v7  ;;  %2481 = vmatprep.subr.mxu0 %v3124_v55 }
 0x2ae   :  { %v882_v6 = vpop.xlane.xlu0 %881  ;;  %2468 = vmatpush3.msra.mxu1 %v1196_v7 }
 0x2af   :  { %2612 = vrsqrt.f32 %v889_v17  ;;  %v886_v11 = vmul.f32 0.03125, %v882_v6  ;;  %v1209_v16 = vsub.f32 %v3255_v52, %v3265_v15 }
 0x2b1   :  { %v890_v12 = vadd.f32 1e-08, %v886_v11  ;;  %v3269_v11 = vsub.f32 %v980_v41, %v3259_v1  ;;  %v1210_v34 = vand.u32 4294901760, %v1209_v16 }
 0x2b3   :  { %2614 = vrsqrt.f32 %v890_v12  ;;  %v1203_v12 = vand.u32 4294901760, %v1202_v14 }
 0x2b5   :  { %2469 = vmatprep.subr.mxu1 %v1203_v12 }
 0x2b6   :  { %v2609_v21 = vpop.eup %2608  ;;  %2470 = vmatpush3.msra.mxu1 %v1203_v12 }
 0x2b7   :  { %v896_v26 = vmul.f32 %v2609_v21, %v3070_v0  ;;  %2471 = vmatprep.subr.mxu1 %v1210_v34 }
 0x2b8   :  { %v2611_v42 = vpop.eup %2610  ;;  %2472 = vmatpush3.msra.mxu1 %v1210_v34 }
 0x2b9   :  { %v907_v0 = vmul.f32 %v2044_v22, %v896_v26  ;;  %v895_v8 = vmul.f32 %v2611_v42, %v3072_v3  ;;  %v3278_v26 = vand.u32 4294901760, %v3269_v11 }
 0x2bb   :  { %v918_v3 = vadd.f32 %v2045_v43, %v907_v0  ;;  %v906_v40 = vmul.f32 %v2044_v22, %v895_v8  ;;  %v1216_v8 = vsub.f32 %v3269_v11, %v3278_v26 }
 0x2bc   :  { %v2613_v44 = vpop.eup %2612 }
 0x2bd   :  { %v922_v54 = vmax.f32 %v918_v3, 0.0  ;;  %v917_v58 = vadd.f32 %v2045_v43, %v906_v40  ;;  %v897_v59 = vmul.f32 %v2613_v44, %v3079_v10 }
 0x2bf   :  { %926 = vst.msk [vmem:[#allocation2 + $0x10] sm:$0xff] %vm33_vm0, %v922_v54  ;;  %v921_v17 = vmax.f32 %v917_v58, 0.0  ;;  %v908_v6 = vmul.f32 %v2044_v22, %v897_v59  ;;  %v930_v59 = vld [vmem:[#allocation2] sm:$0xff] }
 0x2c0   :  { %v2615_v10 = vpop.eup %2614 }
 0x2c1   :  { %925 = vst.msk [vmem:[#allocation2 + $0x8] sm:$0xff] %vm33_vm0, %v921_v17  ;;  %v919_v20 = vadd.f32 %v2045_v43, %v908_v6  ;;  %v898_v21 = vmul.f32 %v2615_v10, %v3084_v19  ;;  %v1217_v19 = vand.u32 4294901760, %v1216_v8  ;;  %v932_v10 = vld [vmem:[#allocation2 + $0x18] sm:$0xff] }
 0x2c3   :  { %v923_v42 = vmax.f32 %v919_v20, 0.0  ;;  %v909_v0 = vmul.f32 %v2044_v22, %v898_v21  ;;  %2473 = vmatprep.subr.mxu1 %v1217_v19 }
 0x2c4   :  { %2474 = vmatpush3.msra.mxu1 %v1217_v19 }
 0x2c5   :  { %927 = vst.msk [vmem:[#allocation2 + $0x20] sm:$0xff] %vm33_vm0, %v923_v42  ;;  %v920_v29 = vadd.f32 %v2045_v43, %v909_v0  ;;  %2511 = vmatprep.subr.mxu1 %v3099_v27 }
 0x2c6   :  { %v938_v43 = vld [vmem:[#allocation2 + $0x10] sm:$0xff] }
 0x2c7   :  { %v924_v32 = vmax.f32 %v920_v29, 0.0 }
 0x2c8   :  { %v934_v3 = vld [vmem:[#allocation2 + $0x4] sm:$0xff]  ;;  %v935_v40 = vld [vmem:[#allocation2 + $0xc] sm:$0xff] }
 0x2c9   :  { %928 = vst.msk [vmem:[#allocation2 + $0x28] sm:$0xff] %vm33_vm0, %v924_v32  ;;  %944 = vrot.lane.b32.xlu1 %v934_v3, %s2647_s12  ;;  %946 = vrot.lane.b32.xlu0 %v935_v40, %s2647_s12  ;;  %v931_v22 = vld [vmem:[#allocation2 + $0x8] sm:$0xff] }
 0x2cc   :  { %v936_v41 = vld [vmem:[#allocation2 + $0x1c] sm:$0xff] }
 0x2cd   :  { %960 = vrot.lane.b32.xlu1 %v931_v22, %s2648_s13  ;;  %948 = vrot.lane.b32.xlu0 %v936_v41, %s2647_s12  ;;  %v933_v44 = vld [vmem:[#allocation2 + $0x20] sm:$0xff] }
 0x2d0   :  { %v937_v46 = vld [vmem:[#allocation2 + $0x24] sm:$0xff] }
 0x2d1   :  { %962 = vrot.lane.b32.xlu1 %v938_v43, %s2648_s13  ;;  %964 = vrot.lane.b32.xlu0 %v933_v44, %s2648_s13  ;;  %v939_v50 = vld [vmem:[#allocation2 + $0x28] sm:$0xff] }
 0x2d5   :  { %950 = vrot.lane.b32.xlu1 %v937_v46, %s2647_s12 }
 0x2d9   :  { %966 = vrot.lane.b32.xlu1 %v939_v50, %s2648_s13 }
 0x33b   :  { %v945_v54 = vpop.permute.xlu1 %944  ;;  %v947_v58 = vpop.permute.xlu0 %946 }
 0x33c   :  { %v972_v7 = vsel %vm33_vm0, %v930_v59, %v945_v54  ;;  %v973_v20 = vsel %vm33_vm0, %v931_v22, %v947_v58 }
 0x33f   :  { %v961_v14 = vpop.permute.xlu1 %960  ;;  %v949_v17 = vpop.permute.xlu0 %948 }
 0x340   :  { %v976_v6 = vsel %vm93_vm1, %v972_v7, %v961_v14  ;;  %v974_v21 = vsel %vm33_vm0, %v932_v10, %v949_v17 }
 0x341   :  { %v999_v12 = vsel %vm116_vm2, %v976_v6, 0 }
 0x342   :  { %v3297_v16 = vand.u32 4294901760, %v999_v12 }
 0x343   :  { %v963_v34 = vpop.permute.xlu1 %962  ;;  %v965_v42 = vpop.permute.xlu0 %964 }
 0x344   :  { %v3302_v0 = vsub.f32 %v999_v12, %v3297_v16  ;;  %v977_v8 = vsel %vm93_vm1, %v973_v20, %v963_v34  ;;  %v978_v29 = vsel %vm93_vm1, %v974_v21, %v965_v42  ;;  %2475 = vmatprep.mubr.f32.mxu1 %v3297_v16 }
 0x345   :  { %v1002_v19 = vsel %vm116_vm2, %v977_v8, 0  ;;  %v1005_v32 = vsel %vm116_vm2, %v978_v29, 0 }
 0x346   :  { %v3309_v3 = vand.u32 4294901760, %v1002_v19  ;;  %v3311_v40 = vand.u32 4294901760, %v1005_v32  ;;  %v1089_v22 = vand.u32 4294901760, %v3302_v0 }
 0x347   :  { %v951_v41 = vpop.permute.xlu1 %950 }
 0x348   :  { %v3315_v43 = vsub.f32 %v1002_v19, %v3309_v3  ;;  %v3318_v46 = vsub.f32 %v1005_v32, %v3311_v40  ;;  %2476 = vmatmul.mubr.f32.vlgmr.msra.gmra.mxu1 %v3309_v3  ;;  %v1090_v50 = vsub.f32 %v3302_v0, %v1089_v22  ;;  %v975_v7 = vsel %vm33_vm0, %v933_v44, %v951_v41 }
 0x349   :  { %2512 = vmatpush3.msra.mxu1 %v3099_v27  ;;  %2478 = vmatprep.mubr.f32.mxu1 %v3311_v40 }
 0x34a   :  { %v1099_v54 = vand.u32 4294901760, %v3315_v43  ;;  %2513 = vmatprep.subr.mxu1 %v3101_v31  ;;  %v1091_v58 = vand.u32 4294901760, %v1090_v50  ;;  %v1109_v59 = vand.u32 4294901760, %v3318_v46 }
 0x34b   :  { %2514 = vmatpush3.msra.mxu1 %v3101_v31  ;;  %v967_v14 = vpop.permute.xlu1 %966 }
 0x34c   :  { %v1100_v17 = vsub.f32 %v3315_v43, %v1099_v54  ;;  %v979_v6 = vsel %vm93_vm1, %v975_v7, %v967_v14  ;;  %2515 = vmatprep.subr.mxu1 %v3103_v33  ;;  %2445 = vmatprep.mubr.f32.mxu0 %v1091_v58  ;;  %v1110_v10 = vsub.f32 %v3318_v46, %v1109_v59 }
 0x34d   :  { %v1008_v12 = vsel %vm116_vm2, %v979_v6, 0  ;;  %2516 = vmatpush3.msra.mxu1 %v3103_v33 }
 0x34e   :  { %v1101_v20 = vand.u32 4294901760, %v1100_v17  ;;  %v3335_v21 = vand.u32 4294901760, %v1008_v12  ;;  %2517 = vmatprep.subr.mxu1 %v3114_v45  ;;  %v1111_v44 = vand.u32 4294901760, %v1110_v10 }
 0x34f   :  { %2518 = vmatpush3.msra.mxu1 %v3114_v45 }
 0x350   :  { %v3340_v34 = vsub.f32 %v1008_v12, %v3335_v21  ;;  %2519 = vmatprep.subr.mxu1 %v3116_v47  ;;  %2446 = vmatmul.mubr.f32.vlgmr.msra.gmra.mxu0 %v1101_v20 }
 0x351   :  { %2479 = vmatmul.mubr.f32.gmra.mxu1 %v3335_v21  ;;  %2482 = vmatpush3.msra.mxu0 %v3124_v55 }
 0x352   :  { %2520 = vmatpush3.msra.mxu1 %v3116_v47  ;;  %2448 = vmatprep.mubr.f32.mxu0 %v1111_v44  ;;  %v1119_v42 = vand.u32 4294901760, %v3340_v34 }
 0x353   :  { %2483 = vmatprep.subr.mxu0 %v3127_v56  ;;  %2521 = vmatprep.subr.mxu1 %v3118_v48 }
 0x354   :  { %2535 = vmatprep.mubr.f32.mxu1 %v1089_v22  ;;  %2484 = vmatpush3.msra.mxu0 %v3127_v56  ;;  %v1120_v8 = vsub.f32 %v3340_v34, %v1119_v42 }
 0x355   :  { %2522 = vmatpush3.msra.mxu1 %v3118_v48  ;;  %2485 = vmatprep.subr.mxu0 %v3130_v57 }
 0x356   :  { %2523 = vmatprep.subr.mxu1 %v3133_v60  ;;  %2486 = vmatpush3.msra.mxu0 %v3130_v57  ;;  %v1121_v55 = vand.u32 4294901760, %v1120_v8 }
 0x357   :  { %2524 = vmatpush3.msra.mxu1 %v3133_v60  ;;  %2487 = vmatprep.subr.mxu0 %v3136_v61 }
 0x358   :  { %2525 = vmatprep.subr.mxu1 %v3198_v18  ;;  %2488 = vmatpush3.msra.mxu0 %v3136_v61  ;;  %v2046_v61 = vld [vmem:[%s3526_s6] ss:$0 sm:$0xff] }
 0x359   :  { %2526 = vmatpush3.msra.mxu1 %v3198_v18  ;;  %2489 = vmatprep.subr.mxu0 %v3139_v62 }
 0x35a   :  { %2527 = vmatprep.subr.mxu1 %v3209_v25  ;;  %2449 = vmatmul.mubr.f32.gmra.mxu0 %v1121_v55 }
 0x35b   :  { %2490 = vmatpush3.msra.mxu0 %v3139_v62  ;;  %2528 = vmatpush3.msra.mxu1 %v3209_v25 }
 0x35c   :  { %2491 = vmatprep.subr.mxu0 %v3153_v13  ;;  %2505 = vmatprep.mubr.f32.mxu0 %v3302_v0 }
 0x35d   :  { %2529 = vmatprep.subr.mxu1 %v3226_v63  ;;  %2492 = vmatpush3.msra.mxu0 %v3153_v13 }
 0x35e   :  { %2530 = vmatpush3.msra.mxu1 %v3226_v63  ;;  %2493 = vmatprep.subr.mxu0 %v3160_v30 }
 0x35f   :  { %2531 = vmatprep.subr.mxu1 %v3242_v38  ;;  %2494 = vmatpush3.msra.mxu0 %v3160_v30 }
 0x360   :  { %2532 = vmatpush3.msra.mxu1 %v3242_v38  ;;  %2495 = vmatprep.subr.mxu0 %v3207_v24 }
 0x361   :  { %2533 = vmatprep.subr.mxu1 %v3259_v1  ;;  %2496 = vmatpush3.msra.mxu0 %v3207_v24 }
 0x362   :  { %2534 = vmatpush3.msra.mxu1 %v3259_v1  ;;  %2497 = vmatprep.subr.mxu0 %v3224_v53 }
 0x363   :  { %2536 = vmatmul.mubr.f32.vlgmr.msra.gmra.mxu1 %v1099_v54  ;;  %2571 = vmatprep.subr.mxu1 %v3099_v27 }
 0x364   :  { %2498 = vmatpush3.msra.mxu0 %v3224_v53  ;;  %2538 = vmatprep.mubr.f32.mxu1 %v1109_v59 }
 0x365   :  { %2572 = vmatpush3.msra.mxu1 %v3099_v27  ;;  %2499 = vmatprep.subr.mxu0 %v3240_v37 }
 0x366   :  { %2573 = vmatprep.subr.mxu1 %v3101_v31  ;;  %2500 = vmatpush3.msra.mxu0 %v3240_v37 }
 0x367   :  { %2574 = vmatpush3.msra.mxu1 %v3101_v31  ;;  %2501 = vmatprep.subr.mxu0 %v3255_v52 }
 0x368   :  { %2539 = vmatmul.mubr.f32.gmra.mxu1 %v1119_v42  ;;  %2575 = vmatprep.subr.mxu1 %v3103_v33 }
 0x369   :  { %2502 = vmatpush3.msra.mxu0 %v3255_v52  ;;  %2576 = vmatpush3.msra.mxu1 %v3103_v33 }
 0x36a   :  { %2595 = vmatprep.mubr.f32.mxu1 %v3297_v16  ;;  %2503 = vmatprep.subr.mxu0 %v3269_v11 }
 0x36b   :  { %2577 = vmatprep.subr.mxu1 %v3114_v45  ;;  %2504 = vmatpush3.msra.mxu0 %v3269_v11 }
 0x36c   :  { %2578 = vmatpush3.msra.mxu1 %v3114_v45  ;;  %2506 = vmatmul.mubr.f32.vlgmr.msra.gmra.mxu0 %v3315_v43 }
 0x36d   :  { %2541 = vmatprep.subr.mxu0 %v3143_v4  ;;  %2579 = vmatprep.subr.mxu1 %v3116_v47 }
 0x36e   :  { %2508 = vmatprep.mubr.f32.mxu0 %v3318_v46  ;;  %2542 = vmatpush3.msra.mxu0 %v3143_v4 }
 0x36f   :  { %2580 = vmatpush3.msra.mxu1 %v3116_v47  ;;  %2543 = vmatprep.subr.mxu0 %v3146_v5 }
 0x370   :  { %2581 = vmatprep.subr.mxu1 %v3118_v48  ;;  %2544 = vmatpush3.msra.mxu0 %v3146_v5 }
 0x371   :  { %2582 = vmatpush3.msra.mxu1 %v3118_v48  ;;  %2509 = vmatmul.mubr.f32.gmra.mxu0 %v3340_v34 }
 0x372   :  { %2545 = vmatprep.subr.mxu0 %v3149_v9  ;;  %2583 = vmatprep.subr.mxu1 %v3133_v60 }
 0x373   :  { %2546 = vmatpush3.msra.mxu0 %v3149_v9  ;;  %2565 = vmatprep.mubr.f32.mxu0 %v3297_v16 }
 0x374   :  { %2584 = vmatpush3.msra.mxu1 %v3133_v60  ;;  %2547 = vmatprep.subr.mxu0 %v3156_v23 }
 0x375   :  { %2585 = vmatprep.subr.mxu1 %v3198_v18  ;;  %2548 = vmatpush3.msra.mxu0 %v3156_v23 }
 0x376   :  { %2586 = vmatpush3.msra.mxu1 %v3198_v18  ;;  %2549 = vmatprep.subr.mxu0 %v3169_v28 }
 0x377   :  { %2587 = vmatprep.subr.mxu1 %v3209_v25  ;;  %2550 = vmatpush3.msra.mxu0 %v3169_v28 }
 0x378   :  { %2588 = vmatpush3.msra.mxu1 %v3209_v25  ;;  %2551 = vmatprep.subr.mxu0 %v3176_v36 }
 0x379   :  { %2589 = vmatprep.subr.mxu1 %v3226_v63  ;;  %2552 = vmatpush3.msra.mxu0 %v3176_v36 }
 0x37a   :  { %2590 = vmatpush3.msra.mxu1 %v3226_v63  ;;  %2553 = vmatprep.subr.mxu0 %v3183_v39 }
 0x37b   :  { %2591 = vmatprep.subr.mxu1 %v3242_v38  ;;  %2554 = vmatpush3.msra.mxu0 %v3183_v39 }
 0x37c   :  { %2592 = vmatpush3.msra.mxu1 %v3242_v38  ;;  %2555 = vmatprep.subr.mxu0 %v3221_v49 }
 0x37d   :  { %2593 = vmatprep.subr.mxu1 %v3259_v1  ;;  %2556 = vmatpush3.msra.mxu0 %v3221_v49 }
 0x37e   :  { %2594 = vmatpush3.msra.mxu1 %v3259_v1  ;;  %2557 = vmatprep.subr.mxu0 %v3237_v35 }
 0x37f   :  { %2596 = vmatmul.mubr.f32.vlgmr.msra.gmra.mxu1 %v3309_v3  ;;  %2558 = vmatpush3.msra.mxu0 %v3237_v35 }
 0x380   :  { %2598 = vmatprep.mubr.f32.mxu1 %v3311_v40  ;;  %2559 = vmatprep.subr.mxu0 %v3252_v51 }
 0x381   :  { %2560 = vmatpush3.msra.mxu0 %v3252_v51 }
 0x382   :  { %2561 = vmatprep.subr.mxu0 %v3265_v15 }
 0x383   :  { %2599 = vmatmul.mubr.f32.gmra.mxu1 %v3335_v21  ;;  %2562 = vmatpush3.msra.mxu0 %v3265_v15 }
 0x384   :  { %2563 = vmatprep.subr.mxu0 %v3278_v26 }
 0x385   :  { %2564 = vmatpush3.msra.mxu0 %v3278_v26 }
 0x386   :  { %2566 = vmatmul.mubr.f32.vlgmr.msra.gmra.mxu0 %v3309_v3 }
 0x387   :  { %2568 = vmatprep.mubr.f32.mxu0 %v3311_v40 }
 0x38a   :  { %2569 = vmatmul.mubr.f32.gmra.mxu0 %v3335_v21 }
 0x408   :  { %v2477_v27 = vpop.f32.mrf.mxu1 }
 0x40a   :  { %v1254_v31 = vpop.f32.mrf.mxu1 }
 0x410   :  { %v2447_v33 = vpop.f32.mrf.mxu0 }
 0x411   :  { %v2480_v45 = vpop.f32.mrf.mxu1  ;;  %v1104_v5 = vadd.f32 %v2447_v33, %v2046_v61 }
 0x412   :  { %v1093_v47 = vpop.f32.mrf.mxu0 }
 0x413   :  { %v1266_v48 = vpop.f32.mrf.mxu1  ;;  %v1094_v23 = vadd.f32 %v2046_v61, %v1093_v47  ;;  %v1261_v30 = vadd.f32 %v2477_v27, %v1104_v5 }
 0x415   :  { %v1255_v25 = vadd.f32 %v1254_v31, %v1094_v23 }
 0x41a   :  { %v2450_v56 = vpop.f32.mrf.mxu0 }
 0x41b   :  { %v1124_v39 = vadd.f32 %v2450_v56, %v2046_v61 }
 0x41c   :  { %v1113_v60 = vpop.f32.mrf.mxu0 }
 0x41d   :  { %v1114_v18 = vadd.f32 %v2046_v61, %v1113_v60  ;;  %v1273_v35 = vadd.f32 %v2480_v45, %v1124_v39 }
 0x41f   :  { %v1267_v37 = vadd.f32 %v1266_v48, %v1114_v18 }
 0x423   :  { %v2537_v57 = vpop.f32.mrf.mxu1 }
 0x425   :  { %v1474_v62 = vpop.f32.mrf.mxu1 }
 0x428   :  { %v2540_v9 = vpop.f32.mrf.mxu1 }
 0x42a   :  { %v1490_v28 = vpop.f32.mrf.mxu1 }
 0x42c   :  { %v2507_v4 = vpop.f32.mrf.mxu0 }
 0x42d   :  { %v1376_v24 = vadd.f32 %v2507_v4, %v1261_v30 }
 0x42e   :  { %v1368_v13 = vpop.f32.mrf.mxu0 }
 0x42f   :  { %v1369_v53 = vadd.f32 %v1368_v13, %v1255_v25  ;;  %v1483_v38 = vadd.f32 %v2537_v57, %v1376_v24 }
 0x431   :  { %v2510_v36 = vpop.f32.mrf.mxu0  ;;  %v1475_v26 = vadd.f32 %v1474_v62, %v1369_v53  ;;  %v2047_v53 = vld [vmem:[%s3527_s7] ss:$0 sm:$0xff] }
 0x432   :  { %v1390_v1 = vadd.f32 %v2510_v36, %v1273_v35 }
 0x433   :  { %v1382_v63 = vpop.f32.mrf.mxu0 }
 0x434   :  { %v1383_v15 = vadd.f32 %v1382_v63, %v1267_v37  ;;  %v1499_v3 = vadd.f32 %v2540_v9, %v1390_v1 }
 0x436   :  { %v1491_v22 = vadd.f32 %v1490_v28, %v1383_v15 }
 0x43f   :  { %v2597_v49 = vpop.f32.mrf.mxu1 }
 0x441   :  { %v1706_v51 = vpop.f32.mrf.mxu1 }
 0x443   :  { %v2600_v19 = vpop.f32.mrf.mxu1 }
 0x445   :  { %v1718_v58 = vpop.f32.mrf.mxu1 }
 0x446   :  { %v2567_v52 = vpop.f32.mrf.mxu0 }
 0x447   :  { %v1612_v11 = vadd.f32 %v2567_v52, %v1483_v38  ;;  %v2048_v38 = vld [vmem:[%s3528_s8] ss:$0 sm:$0xff] }
 0x448   :  { %v1605_v16 = vpop.f32.mrf.mxu0 }
 0x449   :  { %v1606_v0 = vadd.f32 %v1605_v16, %v1475_v26  ;;  %v1713_v29 = vadd.f32 %v2597_v49, %v1612_v11  ;;  %v2649_v11 = vmov 1983009808   ;;  %v1818_v16 = vlaneseq }
 0x44a   :  { %v2570_v32 = vpop.f32.mrf.mxu0  ;;  %v1816_v26 = vunpack.c.l.s4 %v2649_v11 }
 0x44b   :  { %v1731_v40 = vsel %vm33_vm0, %v1713_v29, 0.0  ;;  %v1707_v41 = vadd.f32 %v1706_v51, %v1606_v0  ;;  %v1624_v46 = vadd.f32 %v2570_v32, %v1499_v3 }
 0x44c   :  { %1732 = vadd.xlane.f32.xlu1 %v1731_v40  ;;  %v1617_v43 = vpop.f32.mrf.mxu0 }
 0x44d   :  { %v1618_v50 = vadd.f32 %v1617_v43, %v1491_v22  ;;  %v1728_v54 = vsel %vm33_vm0, %v1707_v41, 0.0  ;;  %v1725_v14 = vadd.f32 %v2600_v19, %v1624_v46  ;;  %v1817_v22 = vunpack.c.0.s8 %v1816_v26  ;;  %v1807_v46 = vld [vmem:[%s3520_s0 + $0x8] sm:$0xff] }
 0x44e   :  { %1729 = vadd.xlane.f32.xlu0 %v1728_v54  ;;  %v2650_v54 = vmov 1934713408  }
 0x44f   :  { %v1719_v59 = vadd.f32 %v1718_v58, %v1618_v50  ;;  %v1737_v17 = vsel %vm33_vm0, %v1725_v14, 0.0  ;;  %v1847_v58 = vunpack.c.l.s4 %v2650_v54 }
 0x451   :  { %v1734_v7 = vsel %vm33_vm0, %v1719_v59, 0.0 }
 0x452   :  { %1735 = vadd.xlane.f32.xlu0 %v1734_v7  ;;  %v1808_v7 = vld [vmem:[%s3520_s0 + $0x10] sm:$0xff] }
 0x456   :  { %1738 = vadd.xlane.f32.xlu0 %v1737_v17  ;;  %v1806_v17 = vld [vmem:[%s3520_s0] sm:$0xff] }
 0x4d5   :  { %v1733_v6 = vpop.xlane.xlu1 %1732 }
 0x4d6   :  { %v1741_v10 = vmul.f32 0.03125, %v1733_v6  ;;  %v1809_v6 = vld [vmem:[%s3520_s0 + $0x18] sm:$0xff]  ;;  %s2651_s0 = smov 96  }
 0x4d7   :  { %v1730_v12 = vpop.xlane.xlu0 %1729 }
 0x4d8   :  { %v1745_v20 = vsub.f32 %v1713_v29, %v1741_v10  ;;  %v1740_v21 = vmul.f32 0.03125, %v1730_v12 }
 0x4da   :  { %v1744_v44 = vsub.f32 %v1707_v41, %v1740_v21  ;;  %v1749_v34 = vmul.f32 %v1745_v20, %v1745_v20  ;;  %v1819_v41 = vshrl.u32 %v1818_v16, 7 }
 0x4db   :  { %v1736_v42 = vpop.xlane.xlu0 %1735 }
 0x4dc   :  { %v1742_v8 = vmul.f32 0.03125, %v1736_v42  ;;  %v1755_v55 = vsel %vm33_vm0, %v1749_v34, 0.0  ;;  %v1748_v27 = vmul.f32 %v1744_v44, %v1744_v44  ;;  %v3473_v12 = vsub.s32 %v1817_v22, %v1819_v41 }
 0x4dd   :  { %1756 = vadd.xlane.f32.xlu0 %v1755_v55 }
 0x4de   :  { %v1746_v31 = vsub.f32 %v1719_v59, %v1742_v8  ;;  %v1752_v33 = vsel %vm33_vm0, %v1748_v27, 0.0 }
 0x4df   :  { %1753 = vadd.xlane.f32.xlu1 %v1752_v33  ;;  %v1739_v45 = vpop.xlane.xlu0 %1738 }
 0x4e0   :  { %v1743_v47 = vmul.f32 0.03125, %v1739_v45  ;;  %v1750_v48 = vmul.f32 %v1746_v31, %v1746_v31 }
 0x4e2   :  { %v1747_v56 = vsub.f32 %v1725_v14, %v1743_v47  ;;  %v1758_v57 = vsel %vm33_vm0, %v1750_v48, 0.0 }
 0x4e3   :  { %1759 = vadd.xlane.f32.xlu1 %v1758_v57 }
 0x4e4   :  { %v1751_v60 = vmul.f32 %v1747_v56, %v1747_v56 }
 0x4e6   :  { %v1761_v61 = vsel %vm33_vm0, %v1751_v60, 0.0 }
 0x4e7   :  { %1762 = vadd.xlane.f32.xlu0 %v1761_v61 }
 0x566   :  { %v1757_v62 = vpop.xlane.xlu0 %1756 }
 0x567   :  { %v1765_v4 = vmul.f32 0.03125, %v1757_v62 }
 0x568   :  { %v1754_v5 = vpop.xlane.xlu1 %1753 }
 0x569   :  { %v1769_v9 = vadd.f32 1e-08, %v1765_v4  ;;  %v1764_v13 = vmul.f32 0.03125, %v1754_v5 }
 0x56b   :  { %2616 = vrsqrt.f32 %v1769_v9  ;;  %v1768_v23 = vadd.f32 1e-08, %v1764_v13 }
 0x56c   :  { %v1760_v30 = vpop.xlane.xlu1 %1759 }
 0x56d   :  { %2618 = vrsqrt.f32 %v1768_v23  ;;  %v1766_v28 = vmul.f32 0.03125, %v1760_v30 }
 0x56f   :  { %v1770_v36 = vadd.f32 1e-08, %v1766_v28 }
 0x570   :  { %v1763_v39 = vpop.xlane.xlu0 %1762 }
 0x571   :  { %2620 = vrsqrt.f32 %v1770_v36  ;;  %v1767_v18 = vmul.f32 0.03125, %v1763_v39 }
 0x573   :  { %v1771_v24 = vadd.f32 1e-08, %v1767_v18 }
 0x575   :  { %2622 = vrsqrt.f32 %v1771_v24 }
 0x578   :  { %v2617_v25 = vpop.eup %2616 }
 0x579   :  { %v1777_v49 = vmul.f32 %v2617_v25, %v1745_v20 }
 0x57a   :  { %v2619_v63 = vpop.eup %2618 }
 0x57b   :  { %v1776_v35 = vmul.f32 %v2619_v63, %v1744_v44  ;;  %v1788_v37 = vmul.f32 %v2047_v53, %v1777_v49  ;;  %v1848_v44 = vunpack.c.0.s8 %v1847_v58 }
 0x57d   :  { %v1787_v52 = vmul.f32 %v2047_v53, %v1776_v35  ;;  %v1799_v15 = vadd.f32 %v2048_v38, %v1788_v37  ;;  %v1851_v47 = vsub.s32 %v1848_v44, %v1819_v41 }
 0x57e   :  { %v2621_v51 = vpop.eup %2620 }
 0x57f   :  { %v1778_v1 = vmul.f32 %v2621_v51, %v1746_v31  ;;  %v1798_v19 = vadd.f32 %v2048_v38, %v1787_v52  ;;  %v1803_v40 = vmax.f32 %v1799_v15, 0.0 }
 0x581   :  { %v1789_v0 = vmul.f32 %v2047_v53, %v1778_v1  ;;  %v1802_v59 = vmax.f32 %v1798_v19, 0.0  ;;  %v1811_v10 = vadd.f32 %v1807_v46, %v1803_v40 }
 0x582   :  { %v2623_v29 = vpop.eup %2622 }
 0x583   :  { %v1779_v32 = vmul.f32 %v2623_v29, %v1747_v56  ;;  %v1800_v3 = vadd.f32 %v2048_v38, %v1789_v0  ;;  %v1810_v34 = vadd.f32 %v1806_v17, %v1802_v59  ;;  %v1887_v8 = vrot.slane %v1811_v10, %v3473_v12 }
 0x584   :  { %v1880_v55 = vcombine.high %v1811_v10, %v2646_v2 }
 0x585   :  { %v1790_v43 = vmul.f32 %v2047_v53, %v1779_v32  ;;  %v1804_v50 = vmax.f32 %v1800_v3, 0.0  ;;  %v1821_v48 = vrot.slane %v1810_v34, %v3473_v12  ;;  %v1814_v61 = vcombine.high %v1810_v34, %v2646_v2 }
 0x586   :  { %v1894_v62 = vrot.slane %v1880_v55, %v3473_v12 }
 0x587   :  { %v1801_v14 = vadd.f32 %v2048_v38, %v1790_v43  ;;  %v1812_v21 = vadd.f32 %v1808_v7, %v1804_v50  ;;  %v1828_v36 = vrot.slane %v1814_v61, %v3473_v12 }
 0x589   :  { %v1805_v20 = vmax.f32 %v1801_v14, 0.0  ;;  %v1836_v31 = vrot.slane %v1812_v21, %v3473_v12  ;;  %v1829_v45 = vcombine.high %v1812_v21, %v2646_v2 }
 0x58b   :  { %v1813_v42 = vadd.f32 %v1809_v6, %v1805_v20  ;;  %v1845_v9 = vcombine.high %v1821_v48, %v1836_v31  ;;  %v1843_v13 = vrot.slane %v1829_v45, %v3473_v12  ;;  %v1844_v28 = vcombine.low %v1821_v48, %v1836_v31 }
 0x58d   :  { %v1902_v27 = vrot.slane %v1813_v42, %v3473_v12  ;;  %v1895_v33 = vcombine.high %v1813_v42, %v2646_v2  ;;  %v1859_v39 = vrot.slane %v1845_v9, %v1851_v47  ;;  %v1860_v18 = vcombine.low %v1828_v36, %v1843_v13 }
 0x58e   :  { %v1852_v25 = vrot.slane %v1844_v28, %v1851_v47  ;;  %v1861_v52 = vcombine.high %v1828_v36, %v1843_v13 }
 0x58f   :  { %v1911_v56 = vcombine.high %v1887_v8, %v1902_v27  ;;  %v1910_v57 = vcombine.low %v1887_v8, %v1902_v27  ;;  %v1909_v60 = vrot.slane %v1895_v33, %v3473_v12  ;;  %v1877_v53 = vcombine.high %v1859_v39, %v2646_v2 }
 0x590   :  { %v1868_v63 = vrot.slane %v1860_v18, %v1851_v47  ;;  %v1876_v35 = vcombine.high %v1852_v25, %v2646_v2  ;;  %v1875_v15 = vrot.slane %v1861_v52, %v1851_v47 }
 0x591   :  { %v1925_v4 = vrot.slane %v1911_v56, %v1851_v47  ;;  %v1918_v5 = vrot.slane %v1910_v57, %v1851_v47  ;;  %v1927_v30 = vcombine.high %v1894_v62, %v1909_v60  ;;  %v1926_v49 = vcombine.low %v1894_v62, %v1909_v60 }
 0x592   :  { %v1878_v38 = vcombine.high %v1868_v63, %v2646_v2  ;;  %v1879_v11 = vcombine.high %v1875_v15, %v2646_v2 }
 0x593   :  { %1975 = vrot.lane.b32.xlu0 %v1925_v4, %s2648_s13  ;;  %v1942_v23 = vcombine.high %v1918_v5, %v2646_v2  ;;  %v1941_v24 = vrot.slane %v1927_v30, %v1851_v47  ;;  %v1934_v37 = vrot.slane %v1926_v49, %v1851_v47  ;;  %v1943_v1 = vcombine.high %v1925_v4, %v2646_v2 }
 0x595   :  { %1971 = vrot.lane.b32.xlu1 %v1942_v23, %s2647_s12  ;;  %v1944_v51 = vcombine.high %v1934_v37, %v2646_v2  ;;  %v1945_v26 = vcombine.high %v1941_v24, %v2646_v2 }
 0x597   :  { %1951 = vrot.lane.b32.xlu0 %v1859_v39, %s2648_s13 }
 0x599   :  { %1987 = vrot.lane.b32.xlu1 %v1941_v24, %s2648_s13 }
 0x59b   :  { %1955 = vrot.lane.b32.xlu0 %v1877_v53, %s2651_s0 }
 0x59d   :  { %1947 = vrot.lane.b32.xlu1 %v1876_v35, %s2647_s12 }
 0x59f   :  { %1959 = vrot.lane.b32.xlu0 %v1878_v38, %s2647_s12 }
 0x5a1   :  { %1983 = vrot.lane.b32.xlu1 %v1944_v51, %s2647_s12  ;;  %s2652_s12 = smov [#allocation3]  }
 0x5a3   :  { %1979 = vrot.lane.b32.xlu0 %v1943_v1, %s2651_s0 }
 0x5a5   :  { %1963 = vrot.lane.b32.xlu1 %v1875_v15, %s2648_s13  ;;  %s2035_s13 = sshll.u32 %s2652_s12, 4  ;;  %s2036_s13 = int_to_ptr.vmem [resolvable:$true] %s2035_s13 }
 0x5a6   :  { %s2624_s18 = scalar_lea.vmem %s2036_s13, 128  ;;  %p2629_p1 = scmp.lt.s32.totalorder %s2036_s13, %s2036_s13 }
 0x5a7   :  { %p2625_p0 = scmp.ne.s32.totalorder %s2036_s13, %s2624_s18  ;;  %p2630_p2 = scmp.lt.s32.totalorder %s2624_s18, %s2624_s18 }
 0x5a9   :  { %1967 = vrot.lane.b32.xlu1 %v1879_v11, %s2651_s0  ;;  %p2631_p3 = por %p2630_p2, %p2629_p1 }
 0x5ab   :  { %p2632_p4 = pnand %p2631_p3, %p2625_p0 }
 0x5ad   :  { %1991 = vrot.lane.b32.xlu1 %v1945_v26, %s2651_s0 }
 0x605   :  { %v1976_v16 = vpop.permute.xlu0 %1975 }
 0x607   :  { %v1972_v0 = vpop.permute.xlu1 %1971 }
 0x608   :  { %v2000_v2 = vsel %vm33_vm0, %v1918_v5, %v1972_v0 }
 0x609   :  { %v1952_v29 = vpop.permute.xlu0 %1951  ;;  %v2001_v6 = vsel %vm93_vm1, %v2000_v2, %v1976_v16 }
 0x60b   :  { %v1988_v19 = vpop.permute.xlu1 %1987 }
 0x60d   :  { %v1956_v3 = vpop.permute.xlu0 %1955 }
 0x60f   :  { %v1948_v32 = vpop.permute.xlu1 %1947 }
 0x610   :  { %v1994_v43 = vsel %vm33_vm0, %v1852_v25, %v1948_v32 }
 0x611   :  { %v1960_v22 = vpop.permute.xlu0 %1959  ;;  %v1995_v50 = vsel %vm93_vm1, %v1994_v43, %v1952_v29 }
 0x612   :  { %v1997_v46 = vsel %vm33_vm0, %v1868_v63, %v1960_v22  ;;  %v1996_v17 = vsel %vm116_vm2, %v1995_v50, %v1956_v3 }
 0x613   :  { %v1984_v40 = vpop.permute.xlu1 %1983 }
 0x614   :  { %v2003_v59 = vsel %vm33_vm0, %v1934_v37, %v1984_v40 }
 0x615   :  { %v1980_v14 = vpop.permute.xlu0 %1979  ;;  %v2004_v20 = vsel %vm93_vm1, %v2003_v59, %v1988_v19 }
 0x616   :  { %v2002_v44 = vsel %vm116_vm2, %v2001_v6, %v1980_v14 }
 0x617   :  { %v1964_v41 = vpop.permute.xlu1 %1963 }
 0x618   :  { %v1998_v54 = vsel %vm93_vm1, %v1997_v46, %v1964_v41 }
 0x61b   :  { %v1968_v58 = vpop.permute.xlu1 %1967 }
 0x61c   :  { %v1999_v7 = vsel %vm116_vm2, %v1998_v54, %v1968_v58 }
 0x61d   :  { %v2010_v10 = vcombine.low %v1996_v17, %v1999_v7 }
 0x61f   :  { %v1992_v21 = vpop.permute.xlu1 %1991  ;;  %v2018_v8 = vrot.slane %v2010_v10, %v3473_v12 }
 0x620   :  { %v2005_v34 = vsel %vm116_vm2, %v2004_v20, %v1992_v21 }
 0x621   :  { %v2011_v42 = vcombine.low %v2002_v44, %v2005_v34 }
 0x623   :  { %v2025_v55 = vrot.slane %v2011_v42, %v3473_v12 }
 0x625   :  { %v2026_v27 = vcombine.low %v2018_v8, %v2025_v55 }
 0x627   :  { %2028 = vst [vmem:[#allocation3] sm:$0xff] %v2026_v27 }
 0x628   :  { %2635 = shalt.err (!%p2632_p4)
}
 0x629   :  { %2038 = dma.vmem_to_hbm [thread:$0]  %s2036_s13, 128, %s3529_s9, [#allocation4]  }
 0x62a   :  { %2644 = dma.done.wait [#allocation4], 128  }
 0x62b   :  { %2645 = vsyncadd [#allocation4], 4294967168 }
 0x62c   :  { %2042 = vsyncpa [#allocation4], 1 }

</bundles_post_ra>
